<compile_context>
chip_gen: v7x
topology: tpu7x:2x2x1
jax: 0.10.0
libtpu: 0.0.40
codegen_flags: <defaults>
</compile_context>

<pallas_src>
import functools

import jax
import jax.numpy as jnp
from jax.experimental import pallas as pl
from jax.experimental.pallas import tpu as pltpu


# ---------------------------------------------------------------------------
# Shift helper: result[k] = x[k - shift] along `axis` (shift in {+1, -1});
# out-of-range positions get `fill` (scalar or broadcastable array).
# Uses an XLU rotate (pltpu.roll -> no relayout copy) when the (sublane, lane)
# tile is natively aligned; falls back to zero-col/row concat + slice otherwise.
# ---------------------------------------------------------------------------
def _shift(x, shift, axis, fill):
    size = x.shape[axis]
    aligned = (x.shape[-1] % 128 == 0) and (x.shape[-2] % 8 == 0) and axis >= x.ndim - 2
    if aligned:
        rolled = pltpu.roll(x, shift % size, axis=axis)      # XLU slot, ~free vs VPU
    else:
        zshape = list(x.shape)
        zshape[axis] = 1
        z = jnp.zeros(zshape, x.dtype)
        if shift == 1:
            rolled = jnp.concatenate(
                [z, jax.lax.slice_in_dim(x, 0, size - 1, axis=axis)], axis=axis)
        else:
            rolled = jnp.concatenate(
                [jax.lax.slice_in_dim(x, 1, size, axis=axis), z], axis=axis)
    idx = jax.lax.broadcasted_iota(jnp.int32, x.shape, axis)
    border = 0 if shift == 1 else size - 1
    return jnp.where(idx == border, fill, rolled)


# ---------------------------------------------------------------------------
# In-kernel Sobel magnitude for one (nb, 3, tileH, W) body tile
# ---------------------------------------------------------------------------
def _sobel_mag_tile(x_ref, top_ref, bot_ref):
    """x_ref: (nb,3,th,W) body rows; top_ref/bot_ref: (nb,3,hh,W) halo blocks whose
    last/first row is the row just above/below the tile (masked to zero at the
    image border == the conv's zero padding).  Returns (nb,3,th,W) f32 magnitude."""
    i = pl.program_id(1)
    nt = pl.num_programs(1)

    nb, c, th, W = x_ref.shape
    m = nb * c
    x = x_ref[...].astype(jnp.float32).reshape(m, th, W)     # leading-dim merge, no relayout

    hh = top_ref.shape[2]
    top_valid = jnp.where(i > 0, jnp.float32(1.0), jnp.float32(0.0))
    bot_valid = jnp.where(i < nt - 1, jnp.float32(1.0), jnp.float32(0.0))
    top = top_ref[:, :, hh - 1:hh, :].astype(jnp.float32).reshape(m, 1, W) * top_valid
    bot = bot_ref[:, :, 0:1, :].astype(jnp.float32).reshape(m, 1, W) * bot_valid

    up = _shift(x, +1, 1, top)        # up[k] = x[k-1]; row 0 from halo / zero pad
    dn = _shift(x, -1, 1, bot)        # dn[k] = x[k+1]; last row from halo / zero pad

    # Separable Sobel (centre row == x, no extra copy):
    #   kernel_v = [[1,2,1],[0,0,0],[-1,-2,-1]]  ->  smooth_W(up - dn)
    #   kernel_h = [[-1,0,1],[-2,0,2],[-1,0,1]]  ->  diff_W(up + 2*x + dn)
    d = up - dn
    s = up + x + x + dn

    zero = jnp.float32(0.0)
    v = _shift(d, +1, 2, zero) + d + d + _shift(d, -1, 2, zero)
    h = _shift(s, -1, 2, zero) - _shift(s, +1, 2, zero)

    mag = jnp.sqrt(v * v + h * h + 1e-6)
    return mag.reshape(nb, c, th, W)


# ---------------------------------------------------------------------------
# Pass 1: per-tile, per-channel min/max of the Sobel magnitude
# ---------------------------------------------------------------------------
def _minmax_kernel(x_ref, top_ref, bot_ref, mn_ref, mx_ref, *, valid_h, mask_pad):
    mag = _sobel_mag_tile(x_ref, top_ref, bot_ref)           # (nb, 3, th, W) f32
    nb, _, th, _ = mag.shape
    if mask_pad:                                             # exclude padded rows
        grow = pl.program_id(1) * th + jax.lax.broadcasted_iota(jnp.int32, mag.shape, 2)
        valid = grow < valid_h
        mn_src = jnp.where(valid, mag, jnp.float32(jnp.inf))
        mx_src = jnp.where(valid, mag, jnp.float32(-jnp.inf))
    else:
        mn_src = mx_src = mag
    mn = jnp.min(mn_src, axis=2)                             # (nb, 3, W) sublane reduce
    mx = jnp.max(mx_src, axis=2)
    mn_c, mx_c = mn[0], mx[0]
    for b in range(1, nb):                                   # small static unroll
        mn_c = jnp.minimum(mn_c, mn[b])
        mx_c = jnp.maximum(mx_c, mx[b])
    mn_ref[0, 0] = mn_c                                      # (3, W); rest reduced in wrapper
    mx_ref[0, 0] = mx_c


# ---------------------------------------------------------------------------
# Pass 2: recompute magnitude and apply the hoisted per-channel normalization
# ---------------------------------------------------------------------------
def _normalize_kernel(norm_ref, x_ref, top_ref, bot_ref, o_ref):
    # norm_ref: SMEM (2, 3) f32 -> row 0 = per-channel min, row 1 = 1/(max - min)
    mag = _sobel_mag_tile(x_ref, top_ref, bot_ref)           # (nb, 3, th, W) f32
    for c in range(3):                                       # unrolled; full-width stores
        o_ref[:, c] = (mag[:, c] - norm_ref[0, c]) * norm_ref[1, c]


# ---------------------------------------------------------------------------
# Tiling plan
# ---------------------------------------------------------------------------
def _plan(N, H, W, itemsize, tile_h=None, target_bytes=2 << 20, max_rows=512):
    sub = 8 * (4 // itemsize)                       # min sublane multiple for the dtype
    # Tile-height budget from a ~2 MiB f32 working block (3 * th * W * 4 bytes).
    budget = max(sub, min(max_rows, ((target_bytes // (3 * W * 4)) // sub) * sub))
    if tile_h is not None:
        if tile_h % sub != 0:
            raise ValueError(f"tile_h must be a multiple of {sub}")
        th = tile_h
        Hp = ((H + th - 1) // th) * th
    elif H % sub == 0:
        th = sub
        for t in range(sub, min(H, budget) + 1, sub):        # largest divisor <= budget
            if H % t == 0:
                th = t
        Hp = H
    else:                                            # pad H so tiling/pipelining survive
        th = max(sub, min(budget, ((H + sub - 1) // sub) * sub))
        Hp = ((H + th - 1) // th) * th
    # Block several batch images per grid step when tiles are small.
    per_img = 3 * th * W * 4
    nb = 1
    for cand in range(1, min(N, 8) + 1):
        if N % cand == 0 and cand * per_img <= target_bytes:
            nb = cand
    return sub, th, Hp, nb


# ---------------------------------------------------------------------------
# Wrapper
# ---------------------------------------------------------------------------
def gradient_forward(x, *, tile_h=None):
    """x: (N, C>=3, H, W) -> (N, 3, H, W) float32 (same semantics as the torch module)."""
    if x.ndim != 4:
        raise ValueError("expected NCHW input")
    N, C, H, W = x.shape
    if C < 3:
        raise ValueError("gradient expects at least 3 input channels")
    # Keep native dtype (f32 / bf16): input is read twice, so no wrapper upcast.
    if x.dtype not in (jnp.float32, jnp.bfloat16):
        x = x.astype(jnp.float32)
    itemsize = jnp.dtype(x.dtype).itemsize

    sub, th, Hp, nb = _plan(N, H, W, itemsize, tile_h)
    pad = Hp - H
    xp = x if pad == 0 else jnp.pad(x, ((0, 0), (0, 0), (0, pad), (0, 0)))

    NB, T = N // nb, Hp // th
    hb, nhb = th // sub, Hp // sub

    # Body tile: only the first 3 channels are ever read (channel-block 0 of size 3).
    body_spec = pl.BlockSpec((nb, 3, th, W), lambda n, i: (n, 0, i, 0))
    # `sub`-row neighbor blocks whose edge rows are the conv halo rows; clamped at
    # the image border and masked to zero in-kernel (== the conv's zero padding).
    top_spec = pl.BlockSpec((nb, 3, sub, W),
                            lambda n, i: (n, 0, jnp.maximum(i * hb - 1, 0), 0))
    bot_spec = pl.BlockSpec((nb, 3, sub, W),
                            lambda n, i: (n, 0, jnp.minimum((i + 1) * hb, nhb - 1), 0))

    cparams = pltpu.CompilerParams(
        dimension_semantics=("parallel", "parallel"),   # independent axes (megacore)
        vmem_limit_bytes=48 * 1024 * 1024,              # < v7x 64 MiB physical VMEM
    )

    # ---- pass 1: per-tile per-channel min/max -----------------------------------
    mn_t, mx_t = pl.pallas_call(
        functools.partial(_minmax_kernel, valid_h=H, mask_pad=(pad > 0)),
        grid=(NB, T),
        in_specs=[body_spec, top_spec, bot_spec],
        out_specs=[pl.BlockSpec((1, 1, 3, W), lambda n, i: (n, i, 0, 0)),
                   pl.BlockSpec((1, 1, 3, W), lambda n, i: (n, i, 0, 0))],
        out_shape=[jax.ShapeDtypeStruct((NB, T, 3, W), jnp.float32),
                   jax.ShapeDtypeStruct((NB, T, 3, W), jnp.float32)],
        compiler_params=cparams,
    )(xp, xp, xp)

    mn = jnp.min(mn_t, axis=(0, 1, 3))                  # (3,) global per-channel min
    mx = jnp.max(mx_t, axis=(0, 1, 3))                  # (3,) global per-channel max
    # Hoisted normalization constants (reciprocal multiply in-kernel).
    # NOTE: matches torch exactly -> no epsilon; a constant channel gives inf/nan.
    norm_tbl = jnp.stack([mn, 1.0 / (mx - mn)], axis=0).astype(jnp.float32)   # (2, 3)

    # ---- pass 2: recompute magnitude (cheap, mem-bound) + normalize --------------
    out = pl.pallas_call(
        _normalize_kernel,
        grid=(NB, T),
        in_specs=[pl.BlockSpec(memory_space=pltpu.MemorySpace.SMEM),
                  body_spec, top_spec, bot_spec],
        out_specs=pl.BlockSpec((nb, 3, th, W), lambda n, i: (n, 0, i, 0)),
        out_shape=jax.ShapeDtypeStruct((N, 3, Hp, W), jnp.float32),
        compiler_params=cparams,
    )(norm_tbl, xp, xp, xp)

    return out if pad == 0 else out[:, :, :H, :]


# ---------------------------------------------------------------------------
# Pure-JAX reference mirroring the PyTorch forward (sanity check)
# ---------------------------------------------------------------------------
def _reference(x):
    x = x.astype(jnp.float32)
    kv = jnp.array([[1, 2, 1], [0, 0, 0], [-1, -2, -1]], jnp.float32).reshape(1, 1, 3, 3)
    kh = jnp.array([[-1, 0, 1], [-2, 0, 2], [-1, 0, 1]], jnp.float32).reshape(1, 1, 3, 3)
    outs = []
    for c in range(3):
        xc = x[:, c:c + 1]
        v = jax.lax.conv_general_dilated(xc, kv, (1, 1), ((1, 1), (1, 1)),
                                         precision=jax.lax.Precision.HIGHEST)
        h = jax.lax.conv_general_dilated(xc, kh, (1, 1), ((1, 1), (1, 1)),
                                         precision=jax.lax.Precision.HIGHEST)
        m = jnp.sqrt(v * v + h * h + 1e-6)
        m = (m - m.min()) / (m.max() - m.min())
        outs.append(m)
    return jnp.concatenate(outs, axis=1)


if __name__ == "__main__":
    # Base case: N=2, C=4 (only the first 3 channels are used), H=W=16.
    x = jax.random.uniform(jax.random.PRNGKey(0), (2, 4, 16, 16), dtype=jnp.float32)
    out = jax.block_until_ready(jax.jit(gradient_forward)(x))
    ref = jax.block_until_ready(_reference(x))
    assert out.shape == (2, 3, 16, 16)
    assert jnp.allclose(out, ref, atol=1e-5), \
        f"mismatch (base), max err {float(jnp.max(jnp.abs(out - ref)))}"

    # Multi-tile case: exercises the cross-tile halo path and, with W=128, the
    # aligned pltpu.roll fast path.
    x2 = jax.random.uniform(jax.random.PRNGKey(1), (2, 4, 32, 128), dtype=jnp.float32)
    out2 = jax.block_until_ready(jax.jit(functools.partial(gradient_forward, tile_h=8))(x2))
    ref2 = jax.block_until_ready(_reference(x2))
    assert jnp.allclose(out2, ref2, atol=1e-5), \
        f"mismatch (tiled), max err {float(jnp.max(jnp.abs(out2 - ref2)))}"

    # H not divisible by 8 (padded fallback) with exactly 3 channels.
    x3 = jax.random.uniform(jax.random.PRNGKey(2), (1, 3, 12, 20), dtype=jnp.float32)
    out3 = jax.block_until_ready(jax.jit(gradient_forward)(x3))
    ref3 = jax.block_until_ready(_reference(x3))
    assert out3.shape == (1, 3, 12, 20)
    assert jnp.allclose(out3, ref3, atol=1e-5), \
        f"mismatch (padded), max err {float(jnp.max(jnp.abs(out3 - ref3)))}"

    print("KERNEL_OK")
</pallas_src>

<mosaic_0001>
module attributes {stable_mosaic.version = 11 : i64} {
  func.func @_minmax_kernel(%arg0: i32, %arg1: i32, %arg2: memref<2x3x16x16xf32, #tpu.memory_space<vmem>>, %arg3: memref<2x3x8x16xf32, #tpu.memory_space<vmem>>, %arg4: memref<2x3x8x16xf32, #tpu.memory_space<vmem>>, %arg5: memref<1x1x3x16xf32, #tpu.memory_space<vmem>>, %arg6: memref<1x1x3x16xf32, #tpu.memory_space<vmem>>) attributes {dimension_semantics = [#tpu.dimension_semantics<parallel>, #tpu.dimension_semantics<parallel>], iteration_bounds = array<i64: 1, 1>, scalar_prefetch = 0 : i64, scratch_operands = 0 : i64, tpu.core_type = #tpu.core_type<tc>, window_params = [{transform_indices = @transform_0, window_bounds = array<i64: 2, 3, 16, 16>}, {transform_indices = @transform_1, window_bounds = array<i64: 2, 3, 8, 16>}, {transform_indices = @transform_2, window_bounds = array<i64: 2, 3, 8, 16>}, {transform_indices = @transform_3, window_bounds = array<i64: 1, 1, 3, 16>}, {transform_indices = @transform_4, window_bounds = array<i64: 1, 1, 3, 16>}]} {
    %c0 = arith.constant 0 : index
    %c0_0 = arith.constant 0 : index
    %c0_1 = arith.constant 0 : index
    %c0_2 = arith.constant 0 : index
    %0 = vector.load %arg2[%c0, %c0_0, %c0_1, %c0_2] : memref<2x3x16x16xf32, #tpu.memory_space<vmem>>, vector<2x3x16x16xf32>
    %1 = vector.shape_cast %0 : vector<2x3x16x16xf32> to vector<6x16x16xf32>
    %c0_i32 = arith.constant 0 : i32
    %2 = arith.cmpi sgt, %arg1, %c0_i32 : i32
    %cst = arith.constant 1.000000e+00 : f32
    %cst_3 = arith.constant 0.000000e+00 : f32
    %3 = arith.select %2, %cst, %cst_3 : f32
    %c0_i32_4 = arith.constant 0 : i32
    %4 = arith.cmpi slt, %arg1, %c0_i32_4 : i32
    %cst_5 = arith.constant 1.000000e+00 : f32
    %cst_6 = arith.constant 0.000000e+00 : f32
    %5 = arith.select %4, %cst_5, %cst_6 : f32
    %c0_7 = arith.constant 0 : index
    %c0_8 = arith.constant 0 : index
    %c7 = arith.constant 7 : index
    %c0_9 = arith.constant 0 : index
    %6 = vector.load %arg3[%c0_7, %c0_8, %c7, %c0_9] : memref<2x3x8x16xf32, #tpu.memory_space<vmem>>, vector<2x3x1x16xf32>
    %7 = vector.shape_cast %6 : vector<2x3x1x16xf32> to vector<6x1x16xf32>
    %8 = vector.broadcast %3 : f32 to vector<6x1x16xf32>
    %9 = arith.mulf %7, %8 : vector<6x1x16xf32>
    %c0_10 = arith.constant 0 : index
    %c0_11 = arith.constant 0 : index
    %c0_12 = arith.constant 0 : index
    %c0_13 = arith.constant 0 : index
    %10 = vector.load %arg4[%c0_10, %c0_11, %c0_12, %c0_13] : memref<2x3x8x16xf32, #tpu.memory_space<vmem>>, vector<2x3x1x16xf32>
    %11 = vector.shape_cast %10 : vector<2x3x1x16xf32> to vector<6x1x16xf32>
    %12 = vector.broadcast %5 : f32 to vector<6x1x16xf32>
    %13 = arith.mulf %11, %12 : vector<6x1x16xf32>
    %cst_14 = arith.constant 0.000000e+00 : f32
    %14 = vector.broadcast %cst_14 : f32 to vector<6x1x16xf32>
    %15 = vector.extract_strided_slice %1 {offsets = [0, 0, 0], sizes = [6, 15, 16], strides = [1, 1, 1]} : vector<6x16x16xf32> to vector<6x15x16xf32>
    %16 = tpu.concatenate %14, %15 in 1 : vector<6x1x16xf32>, vector<6x15x16xf32> -> vector<6x16x16xf32>
    %17 = tpu.iota {dimensions = array<i32: 1>} : vector<6x16x16xi32>
    %c0_i32_15 = arith.constant 0 : i32
    %18 = vector.broadcast %c0_i32_15 : i32 to vector<6x16x16xi32>
    %19 = arith.cmpi eq, %17, %18 : vector<6x16x16xi32>
    %20 = vector.shape_cast %9 : vector<6x1x16xf32> to vector<6x1x16xf32>
    %21 = vector.broadcast %20 : vector<6x1x16xf32> to vector<6x16x16xf32>
    %22 = arith.select %19, %21, %16 : vector<6x16x16xi1>, vector<6x16x16xf32>
    %cst_16 = arith.constant 0.000000e+00 : f32
    %23 = vector.broadcast %cst_16 : f32 to vector<6x1x16xf32>
    %24 = vector.extract_strided_slice %1 {offsets = [0, 1, 0], sizes = [6, 15, 16], strides = [1, 1, 1]} : vector<6x16x16xf32> to vector<6x15x16xf32>
    %25 = tpu.concatenate %24, %23 in 1 : vector<6x15x16xf32>, vector<6x1x16xf32> -> vector<6x16x16xf32>
    %26 = tpu.iota {dimensions = array<i32: 1>} : vector<6x16x16xi32>
    %c15_i32 = arith.constant 15 : i32
    %27 = vector.broadcast %c15_i32 : i32 to vector<6x16x16xi32>
    %28 = arith.cmpi eq, %26, %27 : vector<6x16x16xi32>
    %29 = vector.shape_cast %13 : vector<6x1x16xf32> to vector<6x1x16xf32>
    %30 = vector.broadcast %29 : vector<6x1x16xf32> to vector<6x16x16xf32>
    %31 = arith.select %28, %30, %25 : vector<6x16x16xi1>, vector<6x16x16xf32>
    %32 = arith.subf %22, %31 : vector<6x16x16xf32>
    %33 = arith.addf %22, %1 : vector<6x16x16xf32>
    %34 = arith.addf %33, %1 : vector<6x16x16xf32>
    %35 = arith.addf %34, %31 : vector<6x16x16xf32>
    %cst_17 = arith.constant 0.000000e+00 : f32
    %36 = vector.broadcast %cst_17 : f32 to vector<6x16x1xf32>
    %37 = vector.extract_strided_slice %32 {offsets = [0, 0, 0], sizes = [6, 16, 15], strides = [1, 1, 1]} : vector<6x16x16xf32> to vector<6x16x15xf32>
    %38 = tpu.concatenate %36, %37 in 2 : vector<6x16x1xf32>, vector<6x16x15xf32> -> vector<6x16x16xf32>
    %39 = tpu.iota {dimensions = array<i32: 2>} : vector<6x16x16xi32>
    %c0_i32_18 = arith.constant 0 : i32
    %40 = vector.broadcast %c0_i32_18 : i32 to vector<6x16x16xi32>
    %41 = arith.cmpi eq, %39, %40 : vector<6x16x16xi32>
    %cst_19 = arith.constant 0.000000e+00 : f32
    %42 = vector.broadcast %cst_19 : f32 to vector<6x16x16xf32>
    %43 = arith.select %41, %42, %38 : vector<6x16x16xi1>, vector<6x16x16xf32>
    %44 = arith.addf %43, %32 : vector<6x16x16xf32>
    %45 = arith.addf %44, %32 : vector<6x16x16xf32>
    %cst_20 = arith.constant 0.000000e+00 : f32
    %46 = vector.broadcast %cst_20 : f32 to vector<6x16x1xf32>
    %47 = vector.extract_strided_slice %32 {offsets = [0, 0, 1], sizes = [6, 16, 15], strides = [1, 1, 1]} : vector<6x16x16xf32> to vector<6x16x15xf32>
    %48 = tpu.concatenate %47, %46 in 2 : vector<6x16x15xf32>, vector<6x16x1xf32> -> vector<6x16x16xf32>
    %49 = tpu.iota {dimensions = array<i32: 2>} : vector<6x16x16xi32>
    %c15_i32_21 = arith.constant 15 : i32
    %50 = vector.broadcast %c15_i32_21 : i32 to vector<6x16x16xi32>
    %51 = arith.cmpi eq, %49, %50 : vector<6x16x16xi32>
    %cst_22 = arith.constant 0.000000e+00 : f32
    %52 = vector.broadcast %cst_22 : f32 to vector<6x16x16xf32>
    %53 = arith.select %51, %52, %48 : vector<6x16x16xi1>, vector<6x16x16xf32>
    %54 = arith.addf %45, %53 : vector<6x16x16xf32>
    %cst_23 = arith.constant 0.000000e+00 : f32
    %55 = vector.broadcast %cst_23 : f32 to vector<6x16x1xf32>
    %56 = vector.extract_strided_slice %35 {offsets = [0, 0, 1], sizes = [6, 16, 15], strides = [1, 1, 1]} : vector<6x16x16xf32> to vector<6x16x15xf32>
    %57 = tpu.concatenate %56, %55 in 2 : vector<6x16x15xf32>, vector<6x16x1xf32> -> vector<6x16x16xf32>
    %58 = tpu.iota {dimensions = array<i32: 2>} : vector<6x16x16xi32>
    %c15_i32_24 = arith.constant 15 : i32
    %59 = vector.broadcast %c15_i32_24 : i32 to vector<6x16x16xi32>
    %60 = arith.cmpi eq, %58, %59 : vector<6x16x16xi32>
    %cst_25 = arith.constant 0.000000e+00 : f32
    %61 = vector.broadcast %cst_25 : f32 to vector<6x16x16xf32>
    %62 = arith.select %60, %61, %57 : vector<6x16x16xi1>, vector<6x16x16xf32>
    %cst_26 = arith.constant 0.000000e+00 : f32
    %63 = vector.broadcast %cst_26 : f32 to vector<6x16x1xf32>
    %64 = vector.extract_strided_slice %35 {offsets = [0, 0, 0], sizes = [6, 16, 15], strides = [1, 1, 1]} : vector<6x16x16xf32> to vector<6x16x15xf32>
    %65 = tpu.concatenate %63, %64 in 2 : vector<6x16x1xf32>, vector<6x16x15xf32> -> vector<6x16x16xf32>
    %66 = tpu.iota {dimensions = array<i32: 2>} : vector<6x16x16xi32>
    %c0_i32_27 = arith.constant 0 : i32
    %67 = vector.broadcast %c0_i32_27 : i32 to vector<6x16x16xi32>
    %68 = arith.cmpi eq, %66, %67 : vector<6x16x16xi32>
    %cst_28 = arith.constant 0.000000e+00 : f32
    %69 = vector.broadcast %cst_28 : f32 to vector<6x16x16xf32>
    %70 = arith.select %68, %69, %65 : vector<6x16x16xi1>, vector<6x16x16xf32>
    %71 = arith.subf %62, %70 : vector<6x16x16xf32>
    %72 = arith.mulf %54, %54 : vector<6x16x16xf32>
    %73 = arith.mulf %71, %71 : vector<6x16x16xf32>
    %74 = arith.addf %72, %73 : vector<6x16x16xf32>
    %cst_29 = arith.constant 9.99999997E-7 : f32
    %75 = vector.broadcast %cst_29 : f32 to vector<6x16x16xf32>
    %76 = arith.addf %74, %75 : vector<6x16x16xf32>
    %77 = math.sqrt %76 : vector<6x16x16xf32>
    %78 = vector.shape_cast %77 : vector<6x16x16xf32> to vector<2x3x16x16xf32>
    %cst_30 = arith.constant dense<0x7F800000> : vector<2x3x16xf32>
    %79 = vector.multi_reduction <minimumf>, %78, %cst_30 [2] : vector<2x3x16x16xf32> to vector<2x3x16xf32>
    %cst_31 = arith.constant dense<0xFF800000> : vector<2x3x16xf32>
    %80 = vector.multi_reduction <maximumf>, %78, %cst_31 [2] : vector<2x3x16x16xf32> to vector<2x3x16xf32>
    %81 = vector.extract_strided_slice %79 {offsets = [0, 0, 0], sizes = [1, 3, 16], strides = [1, 1, 1]} : vector<2x3x16xf32> to vector<1x3x16xf32>
    %82 = vector.shape_cast %81 : vector<1x3x16xf32> to vector<3x16xf32>
    %83 = vector.extract_strided_slice %80 {offsets = [0, 0, 0], sizes = [1, 3, 16], strides = [1, 1, 1]} : vector<2x3x16xf32> to vector<1x3x16xf32>
    %84 = vector.shape_cast %83 : vector<1x3x16xf32> to vector<3x16xf32>
    %85 = vector.extract_strided_slice %79 {offsets = [1, 0, 0], sizes = [1, 3, 16], strides = [1, 1, 1]} : vector<2x3x16xf32> to vector<1x3x16xf32>
    %86 = vector.shape_cast %85 : vector<1x3x16xf32> to vector<3x16xf32>
    %87 = arith.minimumf %82, %86 : vector<3x16xf32>
    %88 = vector.extract_strided_slice %80 {offsets = [1, 0, 0], sizes = [1, 3, 16], strides = [1, 1, 1]} : vector<2x3x16xf32> to vector<1x3x16xf32>
    %89 = vector.shape_cast %88 : vector<1x3x16xf32> to vector<3x16xf32>
    %90 = arith.maximumf %84, %89 : vector<3x16xf32>
    %c0_32 = arith.constant 0 : index
    %c0_33 = arith.constant 0 : index
    %c0_34 = arith.constant 0 : index
    %c0_35 = arith.constant 0 : index
    %91 = vector.load %arg5[%c0_32, %c0_33, %c0_34, %c0_35] : memref<1x1x3x16xf32, #tpu.memory_space<vmem>>, vector<1x1x3x16xf32>
    %92 = vector.shape_cast %91 : vector<1x1x3x16xf32> to vector<3x16xf32>
    %93 = vector.shape_cast %87 : vector<3x16xf32> to vector<1x1x3x16xf32>
    tpu.vector_store %arg5[%c0_32, %c0_33, %c0_34, %c0_35], %93 {strides = array<i32>} : memref<1x1x3x16xf32, #tpu.memory_space<vmem>>, vector<1x1x3x16xf32>,
    %c0_36 = arith.constant 0 : index
    %c0_37 = arith.constant 0 : index
    %c0_38 = arith.constant 0 : index
    %c0_39 = arith.constant 0 : index
    %94 = vector.load %arg6[%c0_36, %c0_37, %c0_38, %c0_39] : memref<1x1x3x16xf32, #tpu.memory_space<vmem>>, vector<1x1x3x16xf32>
    %95 = vector.shape_cast %94 : vector<1x1x3x16xf32> to vector<3x16xf32>
    %96 = vector.shape_cast %90 : vector<3x16xf32> to vector<1x1x3x16xf32>
    tpu.vector_store %arg6[%c0_36, %c0_37, %c0_38, %c0_39], %96 {strides = array<i32>} : memref<1x1x3x16xf32, #tpu.memory_space<vmem>>, vector<1x1x3x16xf32>,
    return
  }
  func.func @transform_0(%arg0: i32, %arg1: i32) -> (i32, i32, i32, i32) {
    %c0_i32 = arith.constant 0 : i32
    %c0_i32_0 = arith.constant 0 : i32
    %c0_i32_1 = arith.constant 0 : i32
    return %arg0, %c0_i32, %arg1, %c0_i32_0 : i32, i32, i32, i32
  }
  func.func @transform_1(%arg0: i32, %arg1: i32) -> (i32, i32, i32, i32) {
    %c2_i32 = arith.constant 2 : i32
    %0 = arith.muli %arg1, %c2_i32 : i32
    %c1_i32 = arith.constant 1 : i32
    %1 = arith.subi %0, %c1_i32 : i32
    %c0_i32 = arith.constant 0 : i32
    %2 = arith.maxsi %1, %c0_i32 : i32
    %c0_i32_0 = arith.constant 0 : i32
    %c0_i32_1 = arith.constant 0 : i32
    %c0_i32_2 = arith.constant 0 : i32
    return %arg0, %c0_i32_0, %2, %c0_i32_1 : i32, i32, i32, i32
  }
  func.func @transform_2(%arg0: i32, %arg1: i32) -> (i32, i32, i32, i32) {
    %c1_i32 = arith.constant 1 : i32
    %0 = arith.addi %arg1, %c1_i32 : i32
    %c2_i32 = arith.constant 2 : i32
    %1 = arith.muli %0, %c2_i32 : i32
    %c1_i32_0 = arith.constant 1 : i32
    %2 = arith.minsi %1, %c1_i32_0 : i32
    %c0_i32 = arith.constant 0 : i32
    %c0_i32_1 = arith.constant 0 : i32
    %c0_i32_2 = arith.constant 0 : i32
    return %arg0, %c0_i32, %2, %c0_i32_1 : i32, i32, i32, i32
  }
  func.func @transform_3(%arg0: i32, %arg1: i32) -> (i32, i32, i32, i32) {
    %c0_i32 = arith.constant 0 : i32
    %c0_i32_0 = arith.constant 0 : i32
    %c0_i32_1 = arith.constant 0 : i32
    return %arg0, %arg1, %c0_i32, %c0_i32_0 : i32, i32, i32, i32
  }
  func.func @transform_4(%arg0: i32, %arg1: i32) -> (i32, i32, i32, i32) {
    %c0_i32 = arith.constant 0 : i32
    %c0_i32_0 = arith.constant 0 : i32
    %c0_i32_1 = arith.constant 0 : i32
    return %arg0, %arg1, %c0_i32, %c0_i32_0 : i32, i32, i32, i32
  }
}

module attributes {stable_mosaic.version = 11 : i64} {
  func.func @_normalize_kernel(%arg0: i32, %arg1: i32, %arg2: memref<2x3xf32, #tpu.memory_space<smem>>, %arg3: memref<2x3x16x16xf32, #tpu.memory_space<vmem>>, %arg4: memref<2x3x8x16xf32, #tpu.memory_space<vmem>>, %arg5: memref<2x3x8x16xf32, #tpu.memory_space<vmem>>, %arg6: memref<2x3x16x16xf32, #tpu.memory_space<vmem>>) attributes {dimension_semantics = [#tpu.dimension_semantics<parallel>, #tpu.dimension_semantics<parallel>], iteration_bounds = array<i64: 1, 1>, scalar_prefetch = 0 : i64, scratch_operands = 0 : i64, tpu.core_type = #tpu.core_type<tc>, window_params = [{transform_indices = @transform_0, window_bounds = array<i64: 2, 3>}, {transform_indices = @transform_1, window_bounds = array<i64: 2, 3, 16, 16>}, {transform_indices = @transform_2, window_bounds = array<i64: 2, 3, 8, 16>}, {transform_indices = @transform_3, window_bounds = array<i64: 2, 3, 8, 16>}, {transform_indices = @transform_4, window_bounds = array<i64: 2, 3, 16, 16>}]} {
    %c0 = arith.constant 0 : index
    %c0_0 = arith.constant 0 : index
    %c0_1 = arith.constant 0 : index
    %c0_2 = arith.constant 0 : index
    %0 = vector.load %arg3[%c0, %c0_0, %c0_1, %c0_2] : memref<2x3x16x16xf32, #tpu.memory_space<vmem>>, vector<2x3x16x16xf32>
    %1 = vector.shape_cast %0 : vector<2x3x16x16xf32> to vector<6x16x16xf32>
    %c0_i32 = arith.constant 0 : i32
    %2 = arith.cmpi sgt, %arg1, %c0_i32 : i32
    %cst = arith.constant 1.000000e+00 : f32
    %cst_3 = arith.constant 0.000000e+00 : f32
    %3 = arith.select %2, %cst, %cst_3 : f32
    %c0_i32_4 = arith.constant 0 : i32
    %4 = arith.cmpi slt, %arg1, %c0_i32_4 : i32
    %cst_5 = arith.constant 1.000000e+00 : f32
    %cst_6 = arith.constant 0.000000e+00 : f32
    %5 = arith.select %4, %cst_5, %cst_6 : f32
    %c0_7 = arith.constant 0 : index
    %c0_8 = arith.constant 0 : index
    %c7 = arith.constant 7 : index
    %c0_9 = arith.constant 0 : index
    %6 = vector.load %arg4[%c0_7, %c0_8, %c7, %c0_9] : memref<2x3x8x16xf32, #tpu.memory_space<vmem>>, vector<2x3x1x16xf32>
    %7 = vector.shape_cast %6 : vector<2x3x1x16xf32> to vector<6x1x16xf32>
    %8 = vector.broadcast %3 : f32 to vector<6x1x16xf32>
    %9 = arith.mulf %7, %8 : vector<6x1x16xf32>
    %c0_10 = arith.constant 0 : index
    %c0_11 = arith.constant 0 : index
    %c0_12 = arith.constant 0 : index
    %c0_13 = arith.constant 0 : index
    %10 = vector.load %arg5[%c0_10, %c0_11, %c0_12, %c0_13] : memref<2x3x8x16xf32, #tpu.memory_space<vmem>>, vector<2x3x1x16xf32>
    %11 = vector.shape_cast %10 : vector<2x3x1x16xf32> to vector<6x1x16xf32>
    %12 = vector.broadcast %5 : f32 to vector<6x1x16xf32>
    %13 = arith.mulf %11, %12 : vector<6x1x16xf32>
    %cst_14 = arith.constant 0.000000e+00 : f32
    %14 = vector.broadcast %cst_14 : f32 to vector<6x1x16xf32>
    %15 = vector.extract_strided_slice %1 {offsets = [0, 0, 0], sizes = [6, 15, 16], strides = [1, 1, 1]} : vector<6x16x16xf32> to vector<6x15x16xf32>
    %16 = tpu.concatenate %14, %15 in 1 : vector<6x1x16xf32>, vector<6x15x16xf32> -> vector<6x16x16xf32>
    %17 = tpu.iota {dimensions = array<i32: 1>} : vector<6x16x16xi32>
    %c0_i32_15 = arith.constant 0 : i32
    %18 = vector.broadcast %c0_i32_15 : i32 to vector<6x16x16xi32>
    %19 = arith.cmpi eq, %17, %18 : vector<6x16x16xi32>
    %20 = vector.shape_cast %9 : vector<6x1x16xf32> to vector<6x1x16xf32>
    %21 = vector.broadcast %20 : vector<6x1x16xf32> to vector<6x16x16xf32>
    %22 = arith.select %19, %21, %16 : vector<6x16x16xi1>, vector<6x16x16xf32>
    %cst_16 = arith.constant 0.000000e+00 : f32
    %23 = vector.broadcast %cst_16 : f32 to vector<6x1x16xf32>
    %24 = vector.extract_strided_slice %1 {offsets = [0, 1, 0], sizes = [6, 15, 16], strides = [1, 1, 1]} : vector<6x16x16xf32> to vector<6x15x16xf32>
    %25 = tpu.concatenate %24, %23 in 1 : vector<6x15x16xf32>, vector<6x1x16xf32> -> vector<6x16x16xf32>
    %26 = tpu.iota {dimensions = array<i32: 1>} : vector<6x16x16xi32>
    %c15_i32 = arith.constant 15 : i32
    %27 = vector.broadcast %c15_i32 : i32 to vector<6x16x16xi32>
    %28 = arith.cmpi eq, %26, %27 : vector<6x16x16xi32>
    %29 = vector.shape_cast %13 : vector<6x1x16xf32> to vector<6x1x16xf32>
    %30 = vector.broadcast %29 : vector<6x1x16xf32> to vector<6x16x16xf32>
    %31 = arith.select %28, %30, %25 : vector<6x16x16xi1>, vector<6x16x16xf32>
    %32 = arith.subf %22, %31 : vector<6x16x16xf32>
    %33 = arith.addf %22, %1 : vector<6x16x16xf32>
    %34 = arith.addf %33, %1 : vector<6x16x16xf32>
    %35 = arith.addf %34, %31 : vector<6x16x16xf32>
    %cst_17 = arith.constant 0.000000e+00 : f32
    %36 = vector.broadcast %cst_17 : f32 to vector<6x16x1xf32>
    %37 = vector.extract_strided_slice %32 {offsets = [0, 0, 0], sizes = [6, 16, 15], strides = [1, 1, 1]} : vector<6x16x16xf32> to vector<6x16x15xf32>
    %38 = tpu.concatenate %36, %37 in 2 : vector<6x16x1xf32>, vector<6x16x15xf32> -> vector<6x16x16xf32>
    %39 = tpu.iota {dimensions = array<i32: 2>} : vector<6x16x16xi32>
    %c0_i32_18 = arith.constant 0 : i32
    %40 = vector.broadcast %c0_i32_18 : i32 to vector<6x16x16xi32>
    %41 = arith.cmpi eq, %39, %40 : vector<6x16x16xi32>
    %cst_19 = arith.constant 0.000000e+00 : f32
    %42 = vector.broadcast %cst_19 : f32 to vector<6x16x16xf32>
    %43 = arith.select %41, %42, %38 : vector<6x16x16xi1>, vector<6x16x16xf32>
    %44 = arith.addf %43, %32 : vector<6x16x16xf32>
    %45 = arith.addf %44, %32 : vector<6x16x16xf32>
    %cst_20 = arith.constant 0.000000e+00 : f32
    %46 = vector.broadcast %cst_20 : f32 to vector<6x16x1xf32>
    %47 = vector.extract_strided_slice %32 {offsets = [0, 0, 1], sizes = [6, 16, 15], strides = [1, 1, 1]} : vector<6x16x16xf32> to vector<6x16x15xf32>
    %48 = tpu.concatenate %47, %46 in 2 : vector<6x16x15xf32>, vector<6x16x1xf32> -> vector<6x16x16xf32>
    %49 = tpu.iota {dimensions = array<i32: 2>} : vector<6x16x16xi32>
    %c15_i32_21 = arith.constant 15 : i32
    %50 = vector.broadcast %c15_i32_21 : i32 to vector<6x16x16xi32>
    %51 = arith.cmpi eq, %49, %50 : vector<6x16x16xi32>
    %cst_22 = arith.constant 0.000000e+00 : f32
    %52 = vector.broadcast %cst_22 : f32 to vector<6x16x16xf32>
    %53 = arith.select %51, %52, %48 : vector<6x16x16xi1>, vector<6x16x16xf32>
    %54 = arith.addf %45, %53 : vector<6x16x16xf32>
    %cst_23 = arith.constant 0.000000e+00 : f32
    %55 = vector.broadcast %cst_23 : f32 to vector<6x16x1xf32>
    %56 = vector.extract_strided_slice %35 {offsets = [0, 0, 1], sizes = [6, 16, 15], strides = [1, 1, 1]} : vector<6x16x16xf32> to vector<6x16x15xf32>
    %57 = tpu.concatenate %56, %55 in 2 : vector<6x16x15xf32>, vector<6x16x1xf32> -> vector<6x16x16xf32>
    %58 = tpu.iota {dimensions = array<i32: 2>} : vector<6x16x16xi32>
    %c15_i32_24 = arith.constant 15 : i32
    %59 = vector.broadcast %c15_i32_24 : i32 to vector<6x16x16xi32>
    %60 = arith.cmpi eq, %58, %59 : vector<6x16x16xi32>
    %cst_25 = arith.constant 0.000000e+00 : f32
    %61 = vector.broadcast %cst_25 : f32 to vector<6x16x16xf32>
    %62 = arith.select %60, %61, %57 : vector<6x16x16xi1>, vector<6x16x16xf32>
    %cst_26 = arith.constant 0.000000e+00 : f32
    %63 = vector.broadcast %cst_26 : f32 to vector<6x16x1xf32>
    %64 = vector.extract_strided_slice %35 {offsets = [0, 0, 0], sizes = [6, 16, 15], strides = [1, 1, 1]} : vector<6x16x16xf32> to vector<6x16x15xf32>
    %65 = tpu.concatenate %63, %64 in 2 : vector<6x16x1xf32>, vector<6x16x15xf32> -> vector<6x16x16xf32>
    %66 = tpu.iota {dimensions = array<i32: 2>} : vector<6x16x16xi32>
    %c0_i32_27 = arith.constant 0 : i32
    %67 = vector.broadcast %c0_i32_27 : i32 to vector<6x16x16xi32>
    %68 = arith.cmpi eq, %66, %67 : vector<6x16x16xi32>
    %cst_28 = arith.constant 0.000000e+00 : f32
    %69 = vector.broadcast %cst_28 : f32 to vector<6x16x16xf32>
    %70 = arith.select %68, %69, %65 : vector<6x16x16xi1>, vector<6x16x16xf32>
    %71 = arith.subf %62, %70 : vector<6x16x16xf32>
    %72 = arith.mulf %54, %54 : vector<6x16x16xf32>
    %73 = arith.mulf %71, %71 : vector<6x16x16xf32>
    %74 = arith.addf %72, %73 : vector<6x16x16xf32>
    %cst_29 = arith.constant 9.99999997E-7 : f32
    %75 = vector.broadcast %cst_29 : f32 to vector<6x16x16xf32>
    %76 = arith.addf %74, %75 : vector<6x16x16xf32>
    %77 = math.sqrt %76 : vector<6x16x16xf32>
    %78 = vector.shape_cast %77 : vector<6x16x16xf32> to vector<2x3x16x16xf32>
    %79 = vector.extract_strided_slice %78 {offsets = [0, 0, 0, 0], sizes = [2, 1, 16, 16], strides = [1, 1, 1, 1]} : vector<2x3x16x16xf32> to vector<2x1x16x16xf32>
    %80 = vector.shape_cast %79 : vector<2x1x16x16xf32> to vector<2x16x16xf32>
    %c0_30 = arith.constant 0 : index
    %c0_31 = arith.constant 0 : index
    %81 = memref.load %arg2[%c0_30, %c0_31] : memref<2x3xf32, #tpu.memory_space<smem>>
    %82 = vector.broadcast %81 : f32 to vector<2x16x16xf32>
    %83 = arith.subf %80, %82 : vector<2x16x16xf32>
    %c1 = arith.constant 1 : index
    %c0_32 = arith.constant 0 : index
    %84 = memref.load %arg2[%c1, %c0_32] : memref<2x3xf32, #tpu.memory_space<smem>>
    %85 = vector.broadcast %84 : f32 to vector<2x16x16xf32>
    %86 = arith.mulf %83, %85 : vector<2x16x16xf32>
    %c0_33 = arith.constant 0 : index
    %c0_34 = arith.constant 0 : index
    %c0_35 = arith.constant 0 : index
    %c0_36 = arith.constant 0 : index
    %87 = vector.load %arg6[%c0_33, %c0_34, %c0_35, %c0_36] : memref<2x3x16x16xf32, #tpu.memory_space<vmem>>, vector<2x1x16x16xf32>
    %88 = vector.shape_cast %87 : vector<2x1x16x16xf32> to vector<2x16x16xf32>
    %89 = vector.shape_cast %86 : vector<2x16x16xf32> to vector<2x1x16x16xf32>
    tpu.vector_store %arg6[%c0_33, %c0_34, %c0_35, %c0_36], %89 {strides = array<i32>} : memref<2x3x16x16xf32, #tpu.memory_space<vmem>>, vector<2x1x16x16xf32>,
    %90 = vector.extract_strided_slice %78 {offsets = [0, 1, 0, 0], sizes = [2, 1, 16, 16], strides = [1, 1, 1, 1]} : vector<2x3x16x16xf32> to vector<2x1x16x16xf32>
    %91 = vector.shape_cast %90 : vector<2x1x16x16xf32> to vector<2x16x16xf32>
    %c0_37 = arith.constant 0 : index
    %c1_38 = arith.constant 1 : index
    %92 = memref.load %arg2[%c0_37, %c1_38] : memref<2x3xf32, #tpu.memory_space<smem>>
    %93 = vector.broadcast %92 : f32 to vector<2x16x16xf32>
    %94 = arith.subf %91, %93 : vector<2x16x16xf32>
    %c1_39 = arith.constant 1 : index
    %c1_40 = arith.constant 1 : index
    %95 = memref.load %arg2[%c1_39, %c1_40] : memref<2x3xf32, #tpu.memory_space<smem>>
    %96 = vector.broadcast %95 : f32 to vector<2x16x16xf32>
    %97 = arith.mulf %94, %96 : vector<2x16x16xf32>
    %c0_41 = arith.constant 0 : index
    %c1_42 = arith.constant 1 : index
    %c0_43 = arith.constant 0 : index
    %c0_44 = arith.constant 0 : index
    %98 = vector.load %arg6[%c0_41, %c1_42, %c0_43, %c0_44] : memref<2x3x16x16xf32, #tpu.memory_space<vmem>>, vector<2x1x16x16xf32>
    %99 = vector.shape_cast %98 : vector<2x1x16x16xf32> to vector<2x16x16xf32>
    %100 = vector.shape_cast %97 : vector<2x16x16xf32> to vector<2x1x16x16xf32>
    tpu.vector_store %arg6[%c0_41, %c1_42, %c0_43, %c0_44], %100 {strides = array<i32>} : memref<2x3x16x16xf32, #tpu.memory_space<vmem>>, vector<2x1x16x16xf32>,
    %101 = vector.extract_strided_slice %78 {offsets = [0, 2, 0, 0], sizes = [2, 1, 16, 16], strides = [1, 1, 1, 1]} : vector<2x3x16x16xf32> to vector<2x1x16x16xf32>
    %102 = vector.shape_cast %101 : vector<2x1x16x16xf32> to vector<2x16x16xf32>
    %c0_45 = arith.constant 0 : index
    %c2 = arith.constant 2 : index
    %103 = memref.load %arg2[%c0_45, %c2] : memref<2x3xf32, #tpu.memory_space<smem>>
    %104 = vector.broadcast %103 : f32 to vector<2x16x16xf32>
    %105 = arith.subf %102, %104 : vector<2x16x16xf32>
    %c1_46 = arith.constant 1 : index
    %c2_47 = arith.constant 2 : index
    %106 = memref.load %arg2[%c1_46, %c2_47] : memref<2x3xf32, #tpu.memory_space<smem>>
    %107 = vector.broadcast %106 : f32 to vector<2x16x16xf32>
    %108 = arith.mulf %105, %107 : vector<2x16x16xf32>
    %c0_48 = arith.constant 0 : index
    %c2_49 = arith.constant 2 : index
    %c0_50 = arith.constant 0 : index
    %c0_51 = arith.constant 0 : index
    %109 = vector.load %arg6[%c0_48, %c2_49, %c0_50, %c0_51] : memref<2x3x16x16xf32, #tpu.memory_space<vmem>>, vector<2x1x16x16xf32>
    %110 = vector.shape_cast %109 : vector<2x1x16x16xf32> to vector<2x16x16xf32>
    %111 = vector.shape_cast %108 : vector<2x16x16xf32> to vector<2x1x16x16xf32>
    tpu.vector_store %arg6[%c0_48, %c2_49, %c0_50, %c0_51], %111 {strides = array<i32>} : memref<2x3x16x16xf32, #tpu.memory_space<vmem>>, vector<2x1x16x16xf32>,
    return
  }
  func.func @transform_0(%arg0: i32, %arg1: i32) -> (i32, i32) {
    %c0_i32 = arith.constant 0 : i32
    %c0_i32_0 = arith.constant 0 : i32
    %c0_i32_1 = arith.constant 0 : i32
    return %c0_i32, %c0_i32_0 : i32, i32
  }
  func.func @transform_1(%arg0: i32, %arg1: i32) -> (i32, i32, i32, i32) {
    %c0_i32 = arith.constant 0 : i32
    %c0_i32_0 = arith.constant 0 : i32
    %c0_i32_1 = arith.constant 0 : i32
    return %arg0, %c0_i32, %arg1, %c0_i32_0 : i32, i32, i32, i32
  }
  func.func @transform_2(%arg0: i32, %arg1: i32) -> (i32, i32, i32, i32) {
    %c2_i32 = arith.constant 2 : i32
    %0 = arith.muli %arg1, %c2_i32 : i32
    %c1_i32 = arith.constant 1 : i32
    %1 = arith.subi %0, %c1_i32 : i32
    %c0_i32 = arith.constant 0 : i32
    %2 = arith.maxsi %1, %c0_i32 : i32
    %c0_i32_0 = arith.constant 0 : i32
    %c0_i32_1 = arith.constant 0 : i32
    %c0_i32_2 = arith.constant 0 : i32
    return %arg0, %c0_i32_0, %2, %c0_i32_1 : i32, i32, i32, i32
  }
  func.func @transform_3(%arg0: i32, %arg1: i32) -> (i32, i32, i32, i32) {
    %c1_i32 = arith.constant 1 : i32
    %0 = arith.addi %arg1, %c1_i32 : i32
    %c2_i32 = arith.constant 2 : i32
    %1 = arith.muli %0, %c2_i32 : i32
    %c1_i32_0 = arith.constant 1 : i32
    %2 = arith.minsi %1, %c1_i32_0 : i32
    %c0_i32 = arith.constant 0 : i32
    %c0_i32_1 = arith.constant 0 : i32
    %c0_i32_2 = arith.constant 0 : i32
    return %arg0, %c0_i32, %2, %c0_i32_1 : i32, i32, i32, i32
  }
  func.func @transform_4(%arg0: i32, %arg1: i32) -> (i32, i32, i32, i32) {
    %c0_i32 = arith.constant 0 : i32
    %c0_i32_0 = arith.constant 0 : i32
    %c0_i32_1 = arith.constant 0 : i32
    return %arg0, %c0_i32, %arg1, %c0_i32_0 : i32, i32, i32, i32
  }
}

</mosaic_0001>

<bundles_post_ra>
// kernel: gradient_forward.2
= control target key start
LH: loop header
LB: loop body
LE: loop exit
PB: predicated region body
PF: predicated region fallthrough
CT: control target
= control target key end

     0   :  { %10 = vsyncpa [#allocation3], 0  ;;  %s1814_s0 = inlined_call_operand.hbm [shape: f32[2,4,16,16], index: 0, kind: input, shape index: {}, may-alias: {0,1,2}]   ;;  %s1815_s1 = inlined_call_operand.hbm [shape: f32[2,4,16,16], index: 1, kind: input, shape index: {}, may-alias: {0,1,2}]   ;;  %s1816_s2 = inlined_call_operand.hbm [shape: f32[2,4,16,16], index: 2, kind: input, shape index: {}, may-alias: {0,1,2}]   ;;  %s1817_s3 = inlined_call_operand.vmem [shape: f32[1,1,3,16], index: 3, kind: output, shape index: {0}]   ;;  %s1818_s4 = inlined_call_operand.vmem [shape: f32[1,1,3,16], index: 4, kind: output, shape index: {1}]  }
   0x1   :  { %11 = vsyncpa [#allocation5], 0 }
   0x2   :  { %s21_s15 = sld [smem:[#allocation0]]   ;;  %s1065_s16 = smov [#allocation2]  }
   0x3   :  { %s29_s17 = sshll.u32 %s1065_s16, 4  ;;  %s1066_s18 = smov 1024   ;;  %s30_s17 = int_to_ptr.vmem [resolvable:$true] %s29_s17 }
   0x4   :  { %36 = sst [smem:[#allocation8]] %s1066_s18  ;;  %s1067_s19 = smov 768  }
   0x5   :  { %38 = sst [smem:[#allocation8 + $0x1]] %s1067_s19  ;;  %s1068_s20 = smov 6  }
   0x6   :  { %40 = sst [smem:[#allocation8 + $0x2]] %s1068_s20  ;;  %s1069_s22 = smov 128  }
   0x7   :  { %42 = sst [smem:[#allocation8 + $0x3]] %s1069_s22  ;;  %s1070_s24 = smov 8  }
   0x8   :  { %s1003_s21 = sshll.u32 %s21_s15, 26  ;;  %44 = sst [smem:[#allocation8 + $0x4]] %s1069_s22 }
   0x9   :  { %s1004_s23 = sadd.s32 134217728, %s1003_s21  ;;  %46 = sst [smem:[#allocation8 + $0x5]] %s1070_s24 }
   0xa   :  { %s1071_s25 = smov [#allocation3]   ;;  %s1072_s26 = smov [#allocation7]  }
   0xb   :  { %48 = dma.general %s1814_s0, 1536, %s30_s17, %s1071_s25, %s1072_s26, [#allocation8], %s1004_s23, 0  }
   0xc   :  { %s64_s29 = sld [smem:[#allocation0]]   ;;  %s1073_s30 = smov [#allocation4]  }
   0xd   :  { %s72_s5 = sshll.u32 %s1073_s30, 4  ;;  %s1074_s6 = smov 1024   ;;  %s73_s5 = int_to_ptr.vmem [resolvable:$true] %s72_s5 }
   0xe   :  { %79 = sst [smem:[#allocation10]] %s1074_s6  ;;  %s1075_s7 = smov 384  }
   0xf   :  { %81 = sst [smem:[#allocation10 + $0x1]] %s1075_s7  ;;  %s1076_s8 = smov 3  }
  0x10   :  { %83 = sst [smem:[#allocation10 + $0x2]] %s1076_s8  ;;  %s1077_s10 = smov 256  }
  0x11   :  { %85 = sst [smem:[#allocation10 + $0x3]] %s1077_s10  ;;  %s1078_s12 = smov 128  }
  0x12   :  { %s1005_s9 = sshll.u32 %s64_s29, 26  ;;  %87 = sst [smem:[#allocation10 + $0x4]] %s1078_s12 }
  0x13   :  { %s1006_s11 = sadd.s32 134217728, %s1005_s9  ;;  %s1079_s13 = smov 8  }
  0x14   :  { %89 = sst [smem:[#allocation10 + $0x5]] %s1079_s13  ;;  %s1080_s14 = smov [#allocation5]  }
  0x15   :  { %s1081_s0 = smov [#allocation9]  }
  0x16   :  { %91 = dma.general %s1815_s1, 768, %s73_s5, %s1080_s14, %s1081_s0, [#allocation10], %s1006_s11, 0  }
  0x17   :  { %s102_s19 = scalar_lea.hbm %s1816_s2, 128  ;;  %s107_s20 = sld [smem:[#allocation0]]  }
  0x18   :  { %s1082_s21 = smov [#allocation6]   ;;  %s1083_s23 = smov 1024  }
  0x19   :  { %s115_s22 = sshll.u32 %s1082_s21, 4  ;;  %122 = sst [smem:[#allocation12]] %s1083_s23  ;;  %s116_s22 = int_to_ptr.vmem [resolvable:$true] %s115_s22 }
  0x1a   :  { %s1084_s24 = smov 384   ;;  %s1085_s25 = smov 3  }
  0x1b   :  { %124 = sst [smem:[#allocation12 + $0x1]] %s1084_s24  ;;  %s1086_s27 = smov 256  }
  0x1c   :  { %126 = sst [smem:[#allocation12 + $0x2]] %s1085_s25  ;;  %s1087_s29 = smov 128  }
  0x1d   :  { %s1007_s26 = sshll.u32 %s107_s20, 26  ;;  %128 = sst [smem:[#allocation12 + $0x3]] %s1086_s27 }
  0x1e   :  { %s1008_s28 = sadd.s32 134217728, %s1007_s26  ;;  %130 = sst [smem:[#allocation12 + $0x4]] %s1087_s29 }
  0x1f   :  { %s1088_s1 = smov 8   ;;  %s1089_s30 = smov [#allocation5]  }
  0x20   :  { %132 = sst [smem:[#allocation12 + $0x5]] %s1088_s1  ;;  %s1090_s2 = smov [#allocation11]  }
  0x21   :  { %134 = dma.general %s102_s19, 768, %s116_s22, %s1089_s30, %s1090_s2, [#allocation12], %s1008_s28, 0  }
  0x22   :  { %1061 = dma.done.wait [#allocation3], 1536  }
  0x23   :  { %1062 = vsyncadd [#allocation3], 4294965760 }
  0x24   :  { %1063 = dma.done.wait [#allocation5], 1536  }
  0x25   :  { %1064 = vsyncadd [#allocation5], 4294965760  ;;  %v243_v0 = vlaneseq  ;;  %vm206_vm0 = vcmask 1040384   ;;  %vm284_vm1 = vcmask 1046528   ;;  %v1136_v4 = vld [vmem:[#allocation2 + $0x10] sm:$0xff]  ;;  %v1138_v5 = vld [vmem:[#allocation2 + $0x18] sm:$0xff] }
  0x26   :  { %v169_v6 = vld [vmem:[#allocation4 + $0xf] sm:$0x1]  ;;  %v210_v8 = vrot.slane %v1136_v4, 7  ;;  %v288_v9 = vrot.slane %v1136_v4, 1  ;;  %v289_v10 = vrot.slane %v1138_v5, 1  ;;  %v1145_v11 = vld [vmem:[#allocation2] sm:$0xff] }
  0x27   :  { %v1128_v1 = vshrl.u32 %v243_v0, 7  ;;  %v176_v7 = vmul.f32 0.0, %v169_v6  ;;  %v1147_v12 = vld [vmem:[#allocation2 + $0x8] sm:$0xff]  ;;  %v168_v13 = vld [vmem:[#allocation4 + $0x7] sm:$0x1]  ;;  %v207_v14 = vrot.slane %v1145_v11, 7 }
  0x28   :  { %v285_v15 = vrot.slane %v1145_v11, 1  ;;  %v286_v16 = vrot.slane %v1147_v12, 1  ;;  %v211_v17 = vrot.slane %v1138_v5, 7  ;;  %v238_v18 = vsel %vm206_vm0, 0.0, %v210_v8  ;;  %v182_v22 = vld [vmem:[#allocation6 + $0x8] sm:$0x1] }
  0x29   :  { %v1131_v2 = vadd.s32 8, %v1128_v1  ;;  %v1134_v3 = vsub.s32 0, %v1128_v1  ;;  %vm246_vm2 = vcmp.eq.s32.totalorder %v1128_v1, 0  ;;  %v1156_v20 = vsel %vm284_vm1, %v288_v9, %v289_v10  ;;  %v181_v23 = vld [vmem:[#allocation6] sm:$0x1]  ;;  %v1173_v34 = vld [vmem:[#allocation2 + $0x38] sm:$0xff] }
  0x2a   :  { %v175_v21 = vmul.f32 0.0, %v168_v13  ;;  %v237_v24 = vsel %vm206_vm0, 0.0, %v207_v14  ;;  %v1160_v25 = vsel %vm284_vm1, %v285_v15, %v286_v16  ;;  %v189_v26 = vmul.f32 0.0, %v182_v22  ;;  %v1165_v28 = vld [vmem:[#allocation2 + $0x30] sm:$0xff]  ;;  %v184_v29 = vld [vmem:[#allocation6 + $0x18] sm:$0x1] }
  0x2b   :  { %vm322_vm3 = vcmp.eq.s32.totalorder %v1131_v2, 15  ;;  %v255_v19 = vrot.slane %v176_v7, %v1134_v3  ;;  %v1163_v27 = vsel %vm206_vm0, %v210_v8, %v211_v17  ;;  %v316_v32 = vsel %vm284_vm1, %v289_v10, 0.0  ;;  %v171_v43 = vld [vmem:[#allocation4 + $0x1f] sm:$0x1]  ;;  %s1091_s5 = smov 1   ;;  %v1202_v48 = vld [vmem:[#allocation2 + $0x40] sm:$0xff] }
  0x2c   :  { %v251_v31 = vrot.slane %v175_v21, %v1134_v3  ;;  %v188_v33 = vmul.f32 0.0, %v181_v23  ;;  %v330_v36 = vrot.slane %v189_v26, %v1134_v3  ;;  %v208_v37 = vrot.slane %v1147_v12, 7  ;;  %v185_v49 = vld [vmem:[#allocation6 + $0x20] sm:$0x1]  ;;  %v1214_v54 = vld [vmem:[#allocation2 + $0x48] sm:$0xff]  ;;  %s1092_s6 = smov 127  }
  0x2d   :  { %v1169_v30 = vsel %vm246_vm2, %v255_v19, %v238_v18  ;;  %v315_v38 = vsel %vm284_vm1, %v286_v16, 0.0  ;;  %v191_v41 = vmul.f32 0.0, %v184_v29  ;;  %v216_v42 = vrot.slane %v1165_v28, 7  ;;  %v172_v59 = vld [vmem:[#allocation4 + $0x27] sm:$0x1]  ;;  %v1248_v17 = vld [vmem:[#allocation2 + $0x28] sm:$0xff] }
  0x2e   :  { %v1177_v35 = vsub.f32 %v1169_v30, %v1156_v20  ;;  %v1184_v39 = vsel %vm246_vm2, %v251_v31, %v237_v24  ;;  %v326_v40 = vrot.slane %v188_v33, %v1134_v3  ;;  %v1196_v45 = vsel %vm322_vm3, %v330_v36, %v316_v32  ;;  %v1246_v16 = vld [vmem:[#allocation2 + $0x20] sm:$0xff]  ;;  %v170_v24 = vld [vmem:[#allocation4 + $0x17] sm:$0x1] }
  0x2f   :  { %v1192_v44 = vsub.f32 %v1184_v39, %v1160_v25  ;;  %v1199_v46 = vsel %vm206_vm0, %v207_v14, %v208_v37  ;;  %v217_v47 = vrot.slane %v1173_v34, 7  ;;  %v1206_v50 = vsub.f32 %v1163_v27, %v1196_v45  ;;  %v183_v18 = vld [vmem:[#allocation6 + $0x10] sm:$0x1] }
  0x30   :  { %423 = vrot.lane.b32.xlu1 %v1177_v35, %s1091_s5  ;;  %v1210_v51 = vsel %vm322_vm3, %v326_v40, %v315_v38  ;;  %v295_v52 = vrot.slane %v1173_v34, 1  ;;  %v338_v53 = vrot.slane %v191_v41, %v1134_v3  ;;  %v178_v57 = vmul.f32 0.0, %v171_v43  ;;  %v186_v40 = vld [vmem:[#allocation6 + $0x28] sm:$0x1] }
  0x31   :  { %419 = vrot.lane.b32.xlu0 %v1192_v44, %s1091_s5  ;;  %v1220_v55 = vsub.f32 %v1199_v46, %v1210_v51  ;;  %v1223_v56 = vsel %vm206_vm0, %v216_v42, %v217_v47  ;;  %v240_v58 = vsel %vm206_vm0, 0.0, %v216_v42  ;;  %v294_v61 = vrot.slane %v1165_v28, 1 }
  0x32   :  { %v318_v60 = vsel %vm284_vm1, %v295_v52, 0.0  ;;  %v192_v62 = vmul.f32 0.0, %v185_v49  ;;  %v219_v63 = vrot.slane %v1202_v48, 7  ;;  %v263_v7 = vrot.slane %v178_v57, %v1134_v3  ;;  %v162_v49 = vld [vmem:[#allocation2 + $0x50] sm:$0xff] }
  0x33   :  { %v1233_v6 = vsel %vm322_vm3, %v338_v53, %v318_v60  ;;  %v220_v8 = vrot.slane %v1214_v54, 7  ;;  %v298_v9 = vrot.slane %v1214_v54, 1  ;;  %v1243_v13 = vsel %vm284_vm1, %v294_v61, %v295_v52  ;;  %v163_v52 = vld [vmem:[#allocation2 + $0x58] sm:$0xff] }
  0x34   :  { %425 = vrot.lane.b32.xlu1 %v1206_v50, %s1091_s5  ;;  %v1240_v10 = vsub.f32 %v1223_v56, %v1233_v6  ;;  %v342_v14 = vrot.slane %v192_v62, %v1134_v3  ;;  %v179_v15 = vmul.f32 0.0, %v172_v59  ;;  %v1254_v19 = vsel %vm246_vm2, %v263_v7, %v240_v58  ;;  %v173_v7 = vld [vmem:[#allocation4 + $0x2f] sm:$0x1] }
  0x35   :  { %421 = vrot.lane.b32.xlu0 %v1220_v55, %s1091_s5  ;;  %v1257_v21 = vsel %vm206_vm0, %v219_v63, %v220_v8  ;;  %v319_v22 = vsel %vm284_vm1, %v298_v9, 0.0  ;;  %v241_v23 = vsel %vm206_vm0, 0.0, %v219_v63  ;;  %v1263_v26 = vsub.f32 %v1254_v19, %v1243_v13 }
  0x36   :  { %v1267_v29 = vsel %vm322_vm3, %v342_v14, %v319_v22  ;;  %v267_v31 = vrot.slane %v179_v15, %v1134_v3  ;;  %v297_v32 = vrot.slane %v1202_v48, 1  ;;  %v190_v36 = vmul.f32 0.0, %v183_v18 }
  0x37   :  { %v1275_v33 = vsub.f32 %v1257_v21, %v1267_v29  ;;  %v213_v37 = vrot.slane %v1246_v16, 7  ;;  %v214_v38 = vrot.slane %v1248_v17, 7  ;;  %v292_v43 = vrot.slane %v1248_v17, 1 }
  0x38   :  { %433 = vrot.lane.b32.xlu1 %v1240_v10, %s1091_s5  ;;  %v1281_v41 = vsel %vm246_vm2, %v267_v31, %v241_v23  ;;  %v1284_v42 = vsel %vm284_vm1, %v297_v32, %v298_v9  ;;  %v177_v47 = vmul.f32 0.0, %v170_v24  ;;  %v334_v58 = vrot.slane %v190_v36, %v1134_v3 }
  0x39   :  { %431 = vrot.lane.b32.xlu0 %v1263_v26, %s1091_s5  ;;  %v1291_v53 = vsub.f32 %v1281_v41, %v1284_v42  ;;  %v215_v57 = vsel %vm206_vm0, %v213_v37, %v214_v38  ;;  %v239_v59 = vsel %vm206_vm0, 0.0, %v213_v37  ;;  %v317_v60 = vsel %vm284_vm1, %v292_v43, 0.0 }
  0x3a   :  { %v259_v61 = vrot.slane %v177_v47, %v1134_v3  ;;  %v291_v62 = vrot.slane %v1246_v16, 1  ;;  %v193_v63 = vmul.f32 0.0, %v186_v40  ;;  %v352_v8 = vsel %vm322_vm3, %v334_v58, %v317_v60 }
  0x3b   :  { %v222_v9 = vrot.slane %v162_v49, 7  ;;  %v223_v14 = vrot.slane %v163_v52, 7  ;;  %v301_v15 = vrot.slane %v163_v52, 1  ;;  %v1303_v18 = vsub.f32 %v215_v57, %v352_v8 }
  0x3c   :  { %437 = vrot.lane.b32.xlu1 %v1275_v33, %s1091_s5  ;;  %v276_v22 = vsel %vm246_vm2, %v259_v61, %v239_v59  ;;  %v293_v23 = vsel %vm284_vm1, %v291_v62, %v292_v43  ;;  %v346_v24 = vrot.slane %v193_v63, %v1134_v3  ;;  %v180_v37 = vmul.f32 0.0, %v173_v7 }
  0x3d   :  { %435 = vrot.lane.b32.xlu0 %v1291_v53, %s1091_s5  ;;  %v1311_v31 = vsub.f32 %v276_v22, %v293_v23  ;;  %v224_v32 = vsel %vm206_vm0, %v222_v9, %v223_v14  ;;  %v320_v36 = vsel %vm284_vm1, %v301_v15, 0.0  ;;  %v242_v40 = vsel %vm206_vm0, 0.0, %v222_v9 }
  0x3e   :  { %v358_v38 = vsel %vm322_vm3, %v346_v24, %v320_v36  ;;  %v300_v47 = vrot.slane %v162_v49, 1  ;;  %v271_v58 = vrot.slane %v180_v37, %v1134_v3  ;;  %v376_v61 = vadd.f32 %v215_v57, %v1248_v17 }
  0x3f   :  { %v1320_v43 = vsub.f32 %v224_v32, %v358_v38  ;;  %v375_v3 = vadd.f32 %v276_v22, %v1246_v16  ;;  %v382_v62 = vadd.f32 %v224_v32, %v163_v52  ;;  %vm455_vm4 = vcmask 7168  }
  0x40   :  { %429 = vrot.lane.b32.xlu1 %v1303_v18, %s1091_s5  ;;  %v302_v59 = vsel %vm284_vm1, %v300_v47, %v301_v15  ;;  %v282_v60 = vsel %vm246_vm2, %v271_v58, %v242_v40  ;;  %v388_v63 = vadd.f32 %v376_v61, %v1248_v17  ;;  %v372_v17 = vadd.f32 %v1199_v46, %v1147_v12 }
  0x41   :  { %427 = vrot.lane.b32.xlu0 %v1311_v31, %s1091_s5  ;;  %v1328_v2 = vsub.f32 %v282_v60, %v302_v59  ;;  %v381_v7 = vadd.f32 %v282_v60, %v162_v49  ;;  %v387_v1 = vadd.f32 %v375_v3, %v1246_v16  ;;  %v394_v9 = vadd.f32 %v382_v62, %v163_v52 }
  0x42   :  { %v400_v14 = vadd.f32 %v388_v63, %v352_v8  ;;  %v371_v16 = vadd.f32 %v1184_v39, %v1145_v11  ;;  %v374_v52 = vadd.f32 %v1163_v27, %v1138_v5  ;;  %v373_v46 = vadd.f32 %v1169_v30, %v1136_v4 }
  0x43   :  { %v393_v15 = vadd.f32 %v381_v7, %v162_v49  ;;  %v399_v57 = vadd.f32 %v387_v1, %v293_v23  ;;  %v406_v24 = vadd.f32 %v394_v9, %v358_v38  ;;  %v384_v49 = vadd.f32 %v372_v17, %v1147_v12 }
  0x44   :  { %441 = vrot.lane.b32.xlu1 %v1320_v43, %s1091_s5  ;;  %v383_v8 = vadd.f32 %v371_v16, %v1145_v11  ;;  %v386_v22 = vadd.f32 %v374_v52, %v1138_v5  ;;  %v378_v12 = vadd.f32 %v1223_v56, %v1173_v34  ;;  %v385_v11 = vadd.f32 %v373_v46, %v1136_v4 }
  0x45   :  { %439 = vrot.lane.b32.xlu0 %v1328_v2, %s1091_s5  ;;  %v405_v36 = vadd.f32 %v393_v15, %v302_v59  ;;  %v396_v39 = vadd.f32 %v384_v49, %v1210_v51  ;;  %v377_v30 = vadd.f32 %v1254_v19, %v1165_v28  ;;  %v380_v5 = vadd.f32 %v1257_v21, %v1214_v54 }
  0x46   :  { %v395_v27 = vadd.f32 %v383_v8, %v1160_v25  ;;  %v398_v23 = vadd.f32 %v386_v22, %v1196_v45  ;;  %v390_v51 = vadd.f32 %v378_v12, %v1173_v34  ;;  %v397_v56 = vadd.f32 %v385_v11, %v1156_v20 }
  0x47   :  { %v389_v25 = vadd.f32 %v377_v30, %v1165_v28  ;;  %v379_v4 = vadd.f32 %v1281_v41, %v1202_v48  ;;  %v392_v45 = vadd.f32 %v380_v5, %v1214_v54  ;;  %vm543_vm6 = vcmask 121856  }
  0x48   :  { %509 = vrot.lane.b32.xlu1 %v1220_v55, %s1092_s6  ;;  %v402_v19 = vadd.f32 %v390_v51, %v1233_v6  ;;  %vm857_vm8 = vcmask 130048  }
  0x49   :  { %507 = vrot.lane.b32.xlu0 %v1192_v44, %s1092_s6  ;;  %v401_v34 = vadd.f32 %v389_v25, %v1243_v13  ;;  %v391_v21 = vadd.f32 %v379_v4, %v1202_v48  ;;  %v404_v20 = vadd.f32 %v392_v45, %v1267_v29  ;;  %v1419_v48 = vand.u32 127, %v243_v0 }
  0x4b   :  { %v403_v28 = vadd.f32 %v391_v21, %v1284_v42  ;;  %vm470_vm5 = vcmp.eq.s32.totalorder %v1419_v48, 0  ;;  %vm556_vm7 = vcmp.eq.s32.totalorder %v1419_v48, 15 }
  0x4c   :  { %513 = vrot.lane.b32.xlu1 %v1206_v50, %s1092_s6 }
  0x4d   :  { %511 = vrot.lane.b32.xlu0 %v1177_v35, %s1092_s6 }
  0x50   :  { %521 = vrot.lane.b32.xlu1 %v1240_v10, %s1092_s6 }
  0x51   :  { %519 = vrot.lane.b32.xlu0 %v1263_v26, %s1092_s6 }
  0x54   :  { %525 = vrot.lane.b32.xlu1 %v1275_v33, %s1092_s6 }
  0x55   :  { %523 = vrot.lane.b32.xlu0 %v1291_v53, %s1092_s6 }
  0x58   :  { %595 = vrot.lane.b32.xlu1 %v396_v39, %s1092_s6 }
  0x59   :  { %593 = vrot.lane.b32.xlu0 %v395_v27, %s1092_s6 }
  0x5c   :  { %599 = vrot.lane.b32.xlu1 %v398_v23, %s1092_s6 }
  0x5d   :  { %597 = vrot.lane.b32.xlu0 %v397_v56, %s1092_s6 }
  0x60   :  { %607 = vrot.lane.b32.xlu1 %v402_v19, %s1092_s6 }
  0x61   :  { %605 = vrot.lane.b32.xlu0 %v401_v34, %s1092_s6 }
  0x64   :  { %611 = vrot.lane.b32.xlu1 %v404_v20, %s1092_s6 }
  0x65   :  { %609 = vrot.lane.b32.xlu0 %v403_v28, %s1092_s6 }
  0x68   :  { %655 = vrot.lane.b32.xlu1 %v396_v39, %s1091_s5 }
  0x69   :  { %653 = vrot.lane.b32.xlu0 %v395_v27, %s1091_s5 }
  0x6c   :  { %659 = vrot.lane.b32.xlu1 %v398_v23, %s1091_s5 }
  0x6d   :  { %657 = vrot.lane.b32.xlu0 %v397_v56, %s1091_s5 }
  0x70   :  { %667 = vrot.lane.b32.xlu1 %v402_v19, %s1091_s5 }
  0x71   :  { %665 = vrot.lane.b32.xlu0 %v401_v34, %s1091_s5 }
  0x74   :  { %671 = vrot.lane.b32.xlu1 %v404_v20, %s1091_s5 }
  0x75   :  { %669 = vrot.lane.b32.xlu0 %v403_v28, %s1091_s5 }
  0x78   :  { %517 = vrot.lane.b32.xlu1 %v1303_v18, %s1092_s6 }
  0x79   :  { %515 = vrot.lane.b32.xlu0 %v1311_v31, %s1092_s6 }
  0x7c   :  { %529 = vrot.lane.b32.xlu1 %v1320_v43, %s1092_s6 }
  0x7d   :  { %527 = vrot.lane.b32.xlu0 %v1328_v2, %s1092_s6 }
  0x80   :  { %603 = vrot.lane.b32.xlu1 %v400_v14, %s1092_s6 }
  0x81   :  { %601 = vrot.lane.b32.xlu0 %v399_v57, %s1092_s6 }
  0x84   :  { %615 = vrot.lane.b32.xlu1 %v406_v24, %s1092_s6 }
  0x85   :  { %613 = vrot.lane.b32.xlu0 %v405_v36, %s1092_s6 }
  0x88   :  { %663 = vrot.lane.b32.xlu1 %v400_v14, %s1091_s5 }
  0x89   :  { %661 = vrot.lane.b32.xlu0 %v399_v57, %s1091_s5 }
  0x8c   :  { %675 = vrot.lane.b32.xlu1 %v406_v24, %s1091_s5 }
  0x8d   :  { %673 = vrot.lane.b32.xlu0 %v405_v36, %s1091_s5 }
  0xa2   :  { %v424_v54 = vpop.permute.xlu1 %423 }
  0xa3   :  { %v458_v6 = vsel %vm455_vm4, 0.0, %v424_v54  ;;  %v420_v29 = vpop.permute.xlu0 %419 }
  0xa4   :  { %v473_v13 = vsel %vm470_vm5, 0.0, %v458_v6  ;;  %v456_v41 = vsel %vm455_vm4, 0.0, %v420_v29 }
  0xa5   :  { %v471_v42 = vsel %vm470_vm5, 0.0, %v456_v41  ;;  %v485_v4 = vadd.f32 %v473_v13, %v1177_v35 }
  0xa6   :  { %v426_v32 = vpop.permute.xlu1 %425  ;;  %v483_v12 = vadd.f32 %v471_v42, %v1192_v44 }
  0xa7   :  { %v459_v37 = vsel %vm455_vm4, 0.0, %v426_v32  ;;  %v422_v38 = vpop.permute.xlu0 %421  ;;  %v497_v42 = vadd.f32 %v485_v4, %v1177_v35 }
  0xa8   :  { %v474_v0 = vsel %vm470_vm5, 0.0, %v459_v37  ;;  %v457_v40 = vsel %vm455_vm4, 0.0, %v422_v38  ;;  %v495_v45 = vadd.f32 %v483_v12, %v1192_v44 }
  0xa9   :  { %v472_v47 = vsel %vm470_vm5, 0.0, %v457_v40  ;;  %v486_v23 = vadd.f32 %v474_v0, %v1206_v50 }
  0xaa   :  { %v434_v58 = vpop.permute.xlu1 %433  ;;  %v484_v8 = vadd.f32 %v472_v47, %v1220_v55 }
  0xab   :  { %v463_v59 = vsel %vm455_vm4, 0.0, %v434_v58  ;;  %v432_v61 = vpop.permute.xlu0 %431  ;;  %v498_v54 = vadd.f32 %v486_v23, %v1206_v50 }
  0xac   :  { %v478_v60 = vsel %vm470_vm5, 0.0, %v463_v59  ;;  %v462_v3 = vsel %vm455_vm4, 0.0, %v432_v61  ;;  %v496_v51 = vadd.f32 %v484_v8, %v1220_v55 }
  0xad   :  { %v477_v62 = vsel %vm470_vm5, 0.0, %v462_v3  ;;  %v490_v55 = vadd.f32 %v478_v60, %v1240_v10 }
  0xae   :  { %v438_v63 = vpop.permute.xlu1 %437  ;;  %v489_v44 = vadd.f32 %v477_v62, %v1263_v26 }
  0xaf   :  { %v465_v7 = vsel %vm455_vm4, 0.0, %v438_v63  ;;  %v436_v9 = vpop.permute.xlu0 %435  ;;  %v502_v40 = vadd.f32 %v490_v55, %v1240_v10 }
  0xb0   :  { %v480_v1 = vsel %vm470_vm5, 0.0, %v465_v7  ;;  %v464_v14 = vsel %vm455_vm4, 0.0, %v436_v9  ;;  %v501_v61 = vadd.f32 %v489_v44, %v1263_v26 }
  0xb1   :  { %v479_v15 = vsel %vm470_vm5, 0.0, %v464_v14  ;;  %v492_v50 = vadd.f32 %v480_v1, %v1275_v33 }
  0xb2   :  { %v430_v57 = vpop.permute.xlu1 %429  ;;  %v491_v35 = vadd.f32 %v479_v15, %v1291_v53 }
  0xb3   :  { %v461_v24 = vsel %vm455_vm4, 0.0, %v430_v57  ;;  %v428_v17 = vpop.permute.xlu0 %427  ;;  %v504_v10 = vadd.f32 %v492_v50, %v1275_v33 }
  0xb4   :  { %v1449_v36 = vsel %vm470_vm5, 0.0, %v461_v24  ;;  %v460_v16 = vsel %vm455_vm4, 0.0, %v428_v17  ;;  %v503_v26 = vadd.f32 %v491_v35, %v1291_v53 }
  0xb5   :  { %v1454_v49 = vsel %vm470_vm5, 0.0, %v460_v16 }
  0xb6   :  { %v442_v52 = vpop.permute.xlu1 %441  ;;  %v487_v53 = vadd.f32 %v1454_v49, %v1311_v31 }
  0xb7   :  { %v467_v46 = vsel %vm455_vm4, 0.0, %v442_v52  ;;  %v440_v22 = vpop.permute.xlu0 %439 }
  0xb8   :  { %v1460_v39 = vsel %vm470_vm5, 0.0, %v467_v46  ;;  %v466_v27 = vsel %vm455_vm4, 0.0, %v440_v22  ;;  %v1544_v55 = vadd.f32 %v487_v53, %v1311_v31 }
  0xb9   :  { %v1467_v11 = vsel %vm470_vm5, 0.0, %v466_v27  ;;  %v488_v27 = vadd.f32 %v1449_v36, %v1303_v18 }
  0xba   :  { %v510_v30 = vpop.permute.xlu1 %509 }
  0xbb   :  { %v545_v5 = vsel %vm543_vm6, %v510_v30, 0.0  ;;  %v508_v25 = vpop.permute.xlu0 %507 }
  0xbc   :  { %v558_v56 = vsel %vm556_vm7, 0.0, %v545_v5  ;;  %v544_v34 = vsel %vm543_vm6, %v508_v25, 0.0  ;;  %v494_v25 = vadd.f32 %v1460_v39, %v1320_v43  ;;  %v493_v39 = vadd.f32 %v1467_v11, %v1328_v2 }
  0xbd   :  { %v1475_v19 = vadd.f32 %v558_v56, %v496_v51  ;;  %v557_v21 = vsel %vm556_vm7, 0.0, %v544_v34  ;;  %v1539_v34 = vadd.f32 %v488_v27, %v1303_v18 }
  0xbe   :  { %v514_v20 = vpop.permute.xlu1 %513  ;;  %v1482_v28 = vadd.f32 %v557_v21, %v495_v45 }
  0xbf   :  { %v547_v6 = vsel %vm543_vm6, %v514_v20, 0.0  ;;  %v512_v29 = vpop.permute.xlu0 %511 }
  0xc0   :  { %v560_v13 = vsel %vm556_vm7, 0.0, %v547_v6  ;;  %v546_v32 = vsel %vm543_vm6, %v512_v29, 0.0 }
  0xc1   :  { %v1489_v41 = vadd.f32 %v560_v13, %v498_v54  ;;  %v559_v37 = vsel %vm556_vm7, 0.0, %v546_v32  ;;  %v726_v54 = vmul.f32 %v1475_v19, %v1475_v19  ;;  %v725_v32 = vmul.f32 %v1482_v28, %v1482_v28 }
  0xc2   :  { %v522_v0 = vpop.permute.xlu1 %521  ;;  %v1496_v38 = vadd.f32 %v559_v37, %v497_v42 }
  0xc3   :  { %v551_v47 = vsel %vm543_vm6, %v522_v0, 0.0  ;;  %v520_v59 = vpop.permute.xlu0 %519  ;;  %v1563_v0 = vadd.f32 %v494_v25, %v1320_v43 }
  0xc4   :  { %v564_v58 = vsel %vm556_vm7, 0.0, %v551_v47  ;;  %v550_v3 = vsel %vm543_vm6, %v520_v59, 0.0 }
  0xc5   :  { %v1503_v60 = vadd.f32 %v564_v58, %v502_v40  ;;  %v563_v62 = vsel %vm556_vm7, 0.0, %v550_v3  ;;  %v1572_v3 = vadd.f32 %v493_v39, %v1328_v2 }
  0xc6   :  { %v526_v63 = vpop.permute.xlu1 %525  ;;  %v1509_v7 = vadd.f32 %v563_v62, %v501_v61 }
  0xc7   :  { %v553_v1 = vsel %vm543_vm6, %v526_v63, 0.0  ;;  %v524_v14 = vpop.permute.xlu0 %523 }
  0xc8   :  { %v566_v9 = vsel %vm556_vm7, 0.0, %v553_v1  ;;  %v552_v57 = vsel %vm543_vm6, %v524_v14, 0.0  ;;  %v728_v1 = vmul.f32 %v1489_v41, %v1489_v41  ;;  %v732_v14 = vmul.f32 %v1503_v60, %v1503_v60 }
  0xc9   :  { %v1515_v15 = vadd.f32 %v566_v9, %v504_v10  ;;  %v565_v24 = vsel %vm556_vm7, 0.0, %v552_v57  ;;  %v727_v9 = vmul.f32 %v1496_v38, %v1496_v38  ;;  %v731_v2 = vmul.f32 %v1509_v7, %v1509_v7 }
  0xca   :  { %v596_v17 = vpop.permute.xlu1 %595  ;;  %v1521_v16 = vadd.f32 %v565_v24, %v503_v26 }
  0xcb   :  { %v594_v52 = vpop.permute.xlu0 %593  ;;  %v630_v23 = vsel %vm543_vm6, %v596_v17, 0.0 }
  0xcc   :  { %v629_v5 = vsel %vm543_vm6, %v594_v52, 0.0  ;;  %v642_v4 = vsel %vm556_vm7, 0.0, %v630_v23 }
  0xcd   :  { %v641_v6 = vsel %vm556_vm7, 0.0, %v629_v5 }
  0xce   :  { %v600_v33 = vpop.permute.xlu1 %599 }
  0xcf   :  { %v598_v8 = vpop.permute.xlu0 %597  ;;  %v632_v49 = vsel %vm543_vm6, %v600_v33, 0.0 }
  0xd0   :  { %v631_v29 = vsel %vm543_vm6, %v598_v8, 0.0  ;;  %v644_v11 = vsel %vm556_vm7, 0.0, %v632_v49  ;;  %v734_v8 = vmul.f32 %v1515_v15, %v1515_v15 }
  0xd1   :  { %v643_v59 = vsel %vm556_vm7, 0.0, %v631_v29 }
  0xd2   :  { %v608_v46 = vpop.permute.xlu1 %607 }
  0xd3   :  { %v606_v22 = vpop.permute.xlu0 %605  ;;  %v636_v28 = vsel %vm543_vm6, %v608_v46, 0.0 }
  0xd4   :  { %v648_v24 = vsel %vm556_vm7, 0.0, %v636_v28  ;;  %v635_v17 = vsel %vm543_vm6, %v606_v22, 0.0 }
  0xd5   :  { %v647_v22 = vsel %vm556_vm7, 0.0, %v635_v17 }
  0xd6   :  { %v1523_v12 = vpop.permute.xlu1 %611 }
  0xd7   :  { %v610_v30 = vpop.permute.xlu0 %609  ;;  %v638_v53 = vsel %vm543_vm6, %v1523_v12, 0.0 }
  0xd8   :  { %v637_v23 = vsel %vm543_vm6, %v610_v30, 0.0  ;;  %v650_v49 = vsel %vm556_vm7, 0.0, %v638_v53 }
  0xda   :  { %v656_v51 = vpop.permute.xlu1 %655 }
  0xdb   :  { %v690_v56 = vsel %vm455_vm4, 0.0, %v656_v51  ;;  %v654_v45 = vpop.permute.xlu0 %653 }
  0xdc   :  { %v702_v36 = vsel %vm470_vm5, 0.0, %v690_v56  ;;  %v689_v20 = vsel %vm455_vm4, 0.0, %v654_v45 }
  0xdd   :  { %v714_v21 = vsub.f32 %v642_v4, %v702_v36  ;;  %v701_v18 = vsel %vm470_vm5, 0.0, %v689_v20  ;;  %v733_v4 = vmul.f32 %v1521_v16, %v1521_v16 }
  0xde   :  { %v660_v13 = vpop.permute.xlu1 %659  ;;  %v713_v42 = vsub.f32 %v641_v6, %v701_v18 }
  0xdf   :  { %v738_v44 = vmul.f32 %v714_v21, %v714_v21  ;;  %v692_v31 = vsel %vm455_vm4, 0.0, %v660_v13  ;;  %v658_v37 = vpop.permute.xlu0 %657  ;;  %v649_v21 = vsel %vm556_vm7, 0.0, %v637_v23 }
  0xe0   :  { %v704_v19 = vsel %vm470_vm5, 0.0, %v692_v31  ;;  %v737_v40 = vmul.f32 %v713_v42, %v713_v42  ;;  %v691_v58 = vsel %vm455_vm4, 0.0, %v658_v37 }
  0xe1   :  { %v750_v50 = vadd.f32 %v738_v44, %v726_v54  ;;  %v716_v47 = vsub.f32 %v644_v11, %v704_v19  ;;  %v703_v35 = vsel %vm470_vm5, 0.0, %v691_v58 }
  0xe2   :  { %v668_v61 = vpop.permute.xlu1 %667  ;;  %v749_v43 = vadd.f32 %v737_v40, %v725_v32  ;;  %v715_v10 = vsub.f32 %v643_v59, %v703_v35 }
  0xe3   :  { %v1574_v62 = vadd.f32 1e-06, %v750_v50  ;;  %v740_v63 = vmul.f32 %v716_v47, %v716_v47  ;;  %v696_v26 = vsel %vm455_vm4, 0.0, %v668_v61  ;;  %v666_v57 = vpop.permute.xlu0 %665 }
  0xe4   :  { %v1589_v41 = vadd.f32 1e-06, %v749_v43  ;;  %v739_v38 = vmul.f32 %v715_v10, %v715_v10  ;;  %v708_v60 = vsel %vm470_vm5, 0.0, %v696_v26  ;;  %v695_v7 = vsel %vm455_vm4, 0.0, %v666_v57 }
  0xe5   :  { %1037 = vrsqrt.f32 %v1574_v62  ;;  %v752_v52 = vadd.f32 %v740_v63, %v728_v1  ;;  %v720_v46 = vsub.f32 %v648_v24, %v708_v60  ;;  %v707_v25 = vsel %vm470_vm5, 0.0, %v695_v7 }
  0xe6   :  { %v672_v33 = vpop.permute.xlu1 %671  ;;  %1039 = vrsqrt.f32 %v1589_v41  ;;  %v751_v56 = vadd.f32 %v739_v38, %v727_v9  ;;  %v719_v36 = vsub.f32 %v647_v22, %v707_v25  ;;  %vm782_vm9 = vcmp.eq.f32.partialorder %v1574_v62, inf }
  0xe7   :  { %v698_v27 = vsel %vm455_vm4, 0.0, %v672_v33  ;;  %v670_v51 = vpop.permute.xlu0 %669  ;;  %v1603_v5 = vadd.f32 1e-06, %v752_v52  ;;  %v744_v15 = vmul.f32 %v720_v46, %v720_v46  ;;  %vm784_vm10 = vcmp.eq.f32.partialorder %v1574_v62, 0.0 }
  0xe8   :  { %v710_v12 = vsel %vm470_vm5, 0.0, %v698_v27  ;;  %v697_v30 = vsel %vm455_vm4, 0.0, %v670_v51  ;;  %v1618_v20 = vadd.f32 1e-06, %v751_v56  ;;  %v743_v39 = vmul.f32 %v719_v36, %v719_v36 }
  0xe9   :  { %1041 = vrsqrt.f32 %v1603_v5  ;;  %v756_v16 = vadd.f32 %v744_v15, %v732_v14  ;;  %v722_v54 = vsub.f32 %v650_v49, %v710_v12  ;;  %v709_v18 = vsel %vm470_vm5, 0.0, %v697_v30 }
  0xea   :  { %v518_v45 = vpop.permute.xlu1 %517  ;;  %v785_v44 = vand.u32 2147483648, %v1574_v62  ;;  %vm775_vm11 = vcmp.eq.f32.partialorder %v1589_v41, inf  ;;  %vm777_vm12 = vcmp.eq.f32.partialorder %v1589_v41, 0.0  ;;  %1043 = vrsqrt.f32 %v1618_v20 }
  0xeb   :  { %v516_v6 = vpop.permute.xlu0 %515  ;;  %v549_v13 = vsel %vm543_vm6, %v518_v45, 0.0  ;;  %v1629_v31 = vadd.f32 1e-06, %v756_v16  ;;  %v755_v32 = vadd.f32 %v743_v39, %v731_v2  ;;  %v746_v11 = vmul.f32 %v722_v54, %v722_v54 }
  0xec   :  { %v548_v29 = vsel %vm543_vm6, %v516_v6, 0.0  ;;  %v721_v19 = vsub.f32 %v649_v21, %v709_v18  ;;  %v778_v50 = vand.u32 2147483648, %v1589_v41  ;;  %v562_v40 = vsel %vm556_vm7, 0.0, %v549_v13 }
  0xed   :  { %v561_v47 = vsel %vm556_vm7, 0.0, %v548_v29  ;;  %vm796_vm13 = vcmp.eq.f32.partialorder %v1603_v5, inf  ;;  %vm798_vm14 = vcmp.eq.f32.partialorder %v1603_v5, 0.0  ;;  %v799_v58 = vand.u32 2147483648, %v1603_v5 }
  0xee   :  { %1045 = vrsqrt.f32 %v1629_v31  ;;  %v1644_v35 = vadd.f32 1e-06, %v755_v32  ;;  %v758_v61 = vadd.f32 %v746_v11, %v734_v8  ;;  %v745_v43 = vmul.f32 %v721_v19, %v721_v19  ;;  %v530_v14 = vpop.permute.xlu1 %529 }
  0xef   :  { %v1038_v42 = vpop.eup %1037  ;;  %v574_v1 = vadd.f32 %v562_v40, %v1539_v34  ;;  %v1651_v9 = vadd.f32 %v561_v47, %v1544_v55  ;;  %vm789_vm15 = vcmp.eq.f32.partialorder %v1618_v20, inf  ;;  %vm791_vm0 = vcmp.eq.f32.partialorder %v1618_v20, 0.0  ;;  %v528_v22 = vpop.permute.xlu0 %527 }
  0xf0   :  { %v781_v37 = vmul.f32 %v1038_v42, %v1574_v62  ;;  %v1040_v59 = vpop.eup %1039  ;;  %v792_v26 = vand.u32 2147483648, %v1618_v20  ;;  %1047 = vrsqrt.f32 %v1644_v35  ;;  %v1662_v55 = vadd.f32 1e-06, %v758_v61 }
  0xf1   :  { %v774_v10 = vmul.f32 %v1040_v59, %v1589_v41  ;;  %v757_v52 = vadd.f32 %v745_v43, %v733_v4  ;;  %v555_v38 = vsel %vm543_vm6, %v530_v14, 0.0  ;;  %vm824_vm1 = vcmp.eq.f32.partialorder %v1629_v31, inf }
  0xf2   :  { %v783_v28 = vsel %vm782_vm9, %v1574_v62, %v781_v37  ;;  %1049 = vrsqrt.f32 %v1662_v55  ;;  %vm826_vm2 = vcmp.eq.f32.partialorder %v1629_v31, 0.0  ;;  %v827_v27 = vand.u32 2147483648, %v1629_v31  ;;  %v604_v16 = vpop.permute.xlu1 %603 }
  0xf3   :  { %v786_v63 = vsel %vm784_vm10, %v785_v44, %v783_v28  ;;  %v1042_v57 = vpop.eup %1041  ;;  %v776_v34 = vsel %vm775_vm11, %v1589_v41, %v774_v10  ;;  %vm817_vm3 = vcmp.eq.f32.partialorder %v1644_v35, inf  ;;  %v1681_v51 = vadd.f32 1e-06, %v757_v52 }
  0xf4   :  { %v859_v62 = vsel %vm857_vm8, %v786_v63, inf  ;;  %v913_v2 = vsel %vm857_vm8, %v786_v63, -inf  ;;  %v779_v24 = vsel %vm777_vm12, %v778_v50, %v776_v34  ;;  %v795_v17 = vmul.f32 %v1042_v57, %v1603_v5  ;;  %v1044_v8 = vpop.eup %1043 }
  0xf5   :  { %v858_v60 = vsel %vm857_vm8, %v779_v24, inf  ;;  %v912_v33 = vsel %vm857_vm8, %v779_v24, -inf  ;;  %v788_v23 = vmul.f32 %v1044_v8, %v1618_v20  ;;  %vm819_vm9 = vcmp.eq.f32.partialorder %v1644_v35, 0.0 }
  0xf6   :  { %v860_v46 = vmin.f32 %v858_v60, %v859_v62  ;;  %v914_v7 = vmax.f32 %v912_v33, %v913_v2  ;;  %v797_v41 = vsel %vm796_vm13, %v1603_v5, %v795_v17  ;;  %v820_v25 = vand.u32 2147483648, %v1644_v35 }
  0xf7   :  { %v800_v53 = vsel %vm798_vm14, %v799_v58, %v797_v41  ;;  %v790_v5 = vsel %vm789_vm15, %v1618_v20, %v788_v23  ;;  %1051 = vrsqrt.f32 %v1681_v51  ;;  %vm838_vm10 = vcmp.eq.f32.partialorder %v1662_v55, inf  ;;  %v602_v20 = vpop.permute.xlu0 %601 }
  0xf8   :  { %v861_v56 = vrot.slane %v860_v46, 4  ;;  %v915_v15 = vrot.slane %v914_v7, 4  ;;  %v1046_v4 = vpop.eup %1045  ;;  %v868_v36 = vsel %vm857_vm8, %v800_v53, inf  ;;  %v922_v12 = vsel %vm857_vm8, %v800_v53, -inf }
  0xf9   :  { %v793_v49 = vsel %vm791_vm0, %v792_v26, %v790_v5  ;;  %v823_v21 = vmul.f32 %v1046_v4, %v1629_v31  ;;  %v1697_v6 = vmul.f32 %v574_v1, %v574_v1  ;;  %vm840_vm11 = vcmp.eq.f32.partialorder %v1662_v55, 0.0  ;;  %v616_v26 = vpop.permute.xlu1 %615 }
  0xfa   :  { %v862_v30 = vmin.f32 %v860_v46, %v861_v56  ;;  %v916_v45 = vmax.f32 %v914_v7, %v915_v15  ;;  %v867_v39 = vsel %vm857_vm8, %v793_v49, inf  ;;  %v921_v54 = vsel %vm857_vm8, %v793_v49, -inf  ;;  %v1048_v18 = vpop.eup %1047 }
  0xfb   :  { %v869_v44 = vmin.f32 %v867_v39, %v868_v36  ;;  %v923_v42 = vmax.f32 %v921_v54, %v922_v12  ;;  %v825_v32 = vsel %vm824_vm1, %v1629_v31, %v823_v21  ;;  %v816_v11 = vmul.f32 %v1048_v18, %v1644_v35  ;;  %v614_v52 = vpop.permute.xlu0 %613 }
  0xfc   :  { %v863_v13 = vrot.slane %v862_v30, 2  ;;  %v917_v29 = vrot.slane %v916_v45, 2  ;;  %v841_v19 = vand.u32 2147483648, %v1662_v55  ;;  %v568_v37 = vsel %vm556_vm7, 0.0, %v555_v38  ;;  %v1050_v59 = vpop.eup %1049 }
  0xfd   :  { %v870_v40 = vrot.slane %v869_v44, 4  ;;  %v924_v47 = vrot.slane %v923_v42, 4  ;;  %vm831_vm12 = vcmp.eq.f32.partialorder %v1681_v51, inf  ;;  %v554_v58 = vsel %vm543_vm6, %v528_v22, 0.0  ;;  %v664_v12 = vpop.permute.xlu1 %663 }
  0xfe   :  { %v864_v50 = vmin.f32 %v862_v30, %v863_v13  ;;  %v918_v28 = vmax.f32 %v916_v45, %v917_v29  ;;  %v828_v61 = vsel %vm826_vm2, %v827_v27, %v825_v32  ;;  %v818_v43 = vsel %vm817_vm3, %v1644_v35, %v816_v11 }
  0xff   :  { %v1715_v63 = vadd.f32 %v568_v37, %v1563_v0  ;;  %v871_v10 = vmin.f32 %v869_v44, %v870_v40  ;;  %v925_v1 = vmax.f32 %v923_v42, %v924_v47  ;;  %vm833_vm13 = vcmp.eq.f32.partialorder %v1681_v51, 0.0  ;;  %v662_v39 = vpop.permute.xlu0 %661 }
 0x100   :  { %v834_v14 = vand.u32 2147483648, %v1681_v51  ;;  %v886_v57 = vsel %vm857_vm8, %v828_v61, inf  ;;  %v940_v62 = vsel %vm857_vm8, %v828_v61, -inf  ;;  %v821_v31 = vsel %vm819_vm9, %v820_v25, %v818_v43 }
 0x101   :  { %v837_v2 = vmul.f32 %v1050_v59, %v1662_v55  ;;  %v865_v34 = vrot.slane %v864_v50, 1  ;;  %v872_v24 = vrot.slane %v871_v10, 2  ;;  %v926_v0 = vrot.slane %v925_v1, 2  ;;  %v1052_v38 = vpop.eup %1051 }
 0x102   :  { %v567_v17 = vsel %vm556_vm7, 0.0, %v554_v58  ;;  %v919_v60 = vrot.slane %v918_v28, 1  ;;  %v885_v33 = vsel %vm857_vm8, %v821_v31, inf  ;;  %v939_v8 = vsel %vm857_vm8, %v821_v31, -inf  ;;  %v676_v58 = vpop.permute.xlu1 %675 }
 0x103   :  { %v839_v35 = vsel %vm838_vm10, %v1662_v55, %v837_v2  ;;  %v1731_v46 = vmin.f32 %v871_v10, %v872_v24  ;;  %v1733_v7 = vmax.f32 %v925_v1, %v926_v0  ;;  %v887_v41 = vmin.f32 %v885_v33, %v886_v57  ;;  %v674_v57 = vpop.permute.xlu0 %673 }
 0x104   :  { %v941_v27 = vmax.f32 %v939_v8, %v940_v62  ;;  %v842_v22 = vsel %vm840_vm11, %v841_v19, %v839_v35  ;;  %v830_v53 = vmul.f32 %v1052_v38, %v1681_v51  ;;  %v1740_v23 = vmul.f32 %v1651_v9, %v1651_v9 }
 0x105   :  { %v1743_v56 = vadd.f32 %v567_v17, %v1572_v3  ;;  %v1745_v15 = vmin.f32 %v864_v50, %v865_v34  ;;  %v888_v25 = vrot.slane %v887_v41, 4  ;;  %v634_v36 = vsel %vm543_vm6, %v604_v16, 0.0 }
 0x106   :  { %v942_v4 = vrot.slane %v941_v27, 4  ;;  %v1748_v5 = vmax.f32 %v918_v28, %v919_v60  ;;  %v874_v55 = vrot.slane %v1731_v46, 1  ;;  %v928_v30 = vrot.slane %v1733_v7, 1 }
 0x107   :  { %v832_v9 = vsel %vm831_vm12, %v1681_v51, %v830_v53  ;;  %v889_v45 = vmin.f32 %v887_v41, %v888_v25  ;;  %v895_v49 = vsel %vm857_vm8, %v842_v22, inf  ;;  %v949_v21 = vsel %vm857_vm8, %v842_v22, -inf }
 0x108   :  { %v943_v3 = vmax.f32 %v941_v27, %v942_v4  ;;  %v835_v16 = vsel %vm833_vm13, %v834_v14, %v832_v9  ;;  %v646_v54 = vsel %vm556_vm7, 0.0, %v634_v36  ;;  %v633_v18 = vsel %vm543_vm6, %v602_v20, 0.0 }
 0x109   :  { %v640_v13 = vsel %vm543_vm6, %v616_v26, 0.0  ;;  %v890_v29 = vrot.slane %v889_v45, 2  ;;  %v894_v42 = vsel %vm857_vm8, %v835_v16, inf  ;;  %v948_v32 = vsel %vm857_vm8, %v835_v16, -inf }
 0x10a   :  { %v944_v44 = vrot.slane %v943_v3, 2  ;;  %v896_v11 = vmin.f32 %v894_v42, %v895_v49  ;;  %v950_v19 = vmax.f32 %v948_v32, %v949_v21  ;;  %v645_v37 = vsel %vm556_vm7, 0.0, %v633_v18 }
 0x10b   :  { %v652_v51 = vsel %vm556_vm7, 0.0, %v640_v13  ;;  %v891_v50 = vmin.f32 %v889_v45, %v890_v29  ;;  %v639_v20 = vsel %vm543_vm6, %v614_v52, 0.0  ;;  %v694_v47 = vsel %vm455_vm4, 0.0, %v664_v12 }
 0x10c   :  { %v945_v40 = vmax.f32 %v943_v3, %v944_v44  ;;  %v897_v59 = vrot.slane %v896_v11, 4  ;;  %v951_v28 = vrot.slane %v950_v19, 4  ;;  %v651_v61 = vsel %vm556_vm7, 0.0, %v639_v20 }
 0x10d   :  { %v706_v43 = vsel %vm470_vm5, 0.0, %v694_v47  ;;  %v892_v10 = vrot.slane %v891_v50, 1  ;;  %v693_v26 = vsel %vm455_vm4, 0.0, %v662_v39  ;;  %v700_v34 = vsel %vm455_vm4, 0.0, %v676_v58 }
 0x10e   :  { %v946_v1 = vrot.slane %v945_v40, 1  ;;  %v718_v14 = vsub.f32 %v646_v54, %v706_v43  ;;  %v898_v62 = vmin.f32 %v896_v11, %v897_v59  ;;  %v952_v31 = vmax.f32 %v950_v19, %v951_v28 }
 0x10f   :  { %v705_v2 = vsel %vm470_vm5, 0.0, %v693_v26  ;;  %v893_v24 = vmin.f32 %v891_v50, %v892_v10  ;;  %v712_v33 = vsel %vm470_vm5, 0.0, %v700_v34  ;;  %v699_v8 = vsel %vm455_vm4, 0.0, %v674_v57 }
 0x110   :  { %v947_v0 = vmax.f32 %v945_v40, %v946_v1  ;;  %v742_v17 = vmul.f32 %v718_v14, %v718_v14  ;;  %v717_v52 = vsub.f32 %v645_v37, %v705_v2  ;;  %v899_v38 = vrot.slane %v898_v62, 2 }
 0x111   :  { %v953_v60 = vrot.slane %v952_v31, 2  ;;  %v966_v35 = vmin.f32 %v1745_v15, %v893_v24  ;;  %v724_v4 = vsub.f32 %v652_v51, %v712_v33  ;;  %v711_v36 = vsel %vm470_vm5, 0.0, %v699_v8 }
 0x112   :  { %v969_v41 = vmax.f32 %v1748_v5, %v947_v0  ;;  %v754_v27 = vadd.f32 %v742_v17, %v1697_v6  ;;  %v741_v22 = vmul.f32 %v717_v52, %v717_v52  ;;  %v900_v53 = vmin.f32 %v898_v62, %v899_v38 }
 0x113   :  { %v954_v25 = vmax.f32 %v952_v31, %v953_v60  ;;  %v723_v45 = vsub.f32 %v651_v61, %v711_v36  ;;  %v736_v15 = vmul.f32 %v1715_v63, %v1715_v63  ;;  %v748_v21 = vmul.f32 %v724_v4, %v724_v4 }
 0x114   :  { %v766_v12 = vadd.f32 1e-06, %v754_v27  ;;  %v753_v9 = vadd.f32 %v741_v22, %v1740_v23  ;;  %v901_v3 = vrot.slane %v900_v53, 1  ;;  %v875_v5 = vmin.f32 %v1731_v46, %v874_v55 }
 0x115   :  { %v955_v49 = vrot.slane %v954_v25, 1  ;;  %v929_v6 = vmax.f32 %v1733_v7, %v928_v30  ;;  %v760_v48 = vadd.f32 %v748_v21, %v736_v15  ;;  %vm975_vm4 = vcmask 1041409  }
 0x116   :  { %1053 = vrsqrt.f32 %v766_v12  ;;  %v902_v39 = vmin.f32 %v900_v53, %v901_v3  ;;  %v765_v54 = vadd.f32 1e-06, %v753_v9  ;;  %v735_v23 = vmul.f32 %v1743_v56, %v1743_v56 }
 0x117   :  { %v956_v16 = vmax.f32 %v954_v25, %v955_v49  ;;  %v747_v18 = vmul.f32 %v723_v45, %v723_v45  ;;  %v772_v44 = vadd.f32 1e-06, %v760_v48  ;;  %vm810_vm5 = vcmp.eq.f32.partialorder %v766_v12, inf }
 0x118   :  { %v967_v13 = vmin.f32 %v875_v5, %v902_v39  ;;  %1055 = vrsqrt.f32 %v765_v54  ;;  %v813_v32 = vand.u32 2147483648, %v766_v12  ;;  %vm812_vm6 = vcmp.eq.f32.partialorder %v766_v12, 0.0 }
 0x119   :  { %v970_v29 = vmax.f32 %v929_v6, %v956_v16  ;;  %v759_v63 = vadd.f32 %v747_v18, %v735_v23  ;;  %1057 = vrsqrt.f32 %v772_v44  ;;  %vm803_vm7 = vcmp.eq.f32.partialorder %v765_v54, inf }
 0x11a   :  { %v1794_v42 = vsel %vm975_vm4, %v967_v13, %v966_v35  ;;  %v806_v51 = vand.u32 2147483648, %v765_v54  ;;  %vm805_vm14 = vcmp.eq.f32.partialorder %v765_v54, 0.0  ;;  %vm852_vm15 = vcmp.eq.f32.partialorder %v772_v44, inf }
 0x11b   :  { %v1796_v46 = vsel %vm975_vm4, %v970_v29, %v969_v41  ;;  %v771_v7 = vadd.f32 1e-06, %v759_v63  ;;  %v855_v43 = vand.u32 2147483648, %v772_v44  ;;  %vm854_vm0 = vcmp.eq.f32.partialorder %v772_v44, 0.0 }
 0x11c   :  { %vm980_vm3 = vcmask 124928  }
 0x11d   :  { %1059 = vrsqrt.f32 %v771_v7  ;;  %vm845_vm1 = vcmp.eq.f32.partialorder %v771_v7, inf  ;;  %v848_v34 = vand.u32 2147483648, %v771_v7  ;;  %vm847_vm2 = vcmp.eq.f32.partialorder %v771_v7, 0.0 }
 0x120   :  { %v1054_v55 = vpop.eup %1053 }
 0x121   :  { %v809_v30 = vmul.f32 %v1054_v55, %v766_v12 }
 0x122   :  { %v1056_v11 = vpop.eup %1055 }
 0x123   :  { %v811_v19 = vsel %vm810_vm5, %v766_v12, %v809_v30  ;;  %v802_v37 = vmul.f32 %v1056_v11, %v765_v54  ;;  %v1058_v50 = vpop.eup %1057 }
 0x124   :  { %v814_v56 = vsel %vm812_vm6, %v813_v32, %v811_v19  ;;  %v851_v59 = vmul.f32 %v1058_v50, %v772_v44 }
 0x125   :  { %v877_v40 = vsel %vm857_vm8, %v814_v56, inf  ;;  %v931_v20 = vsel %vm857_vm8, %v814_v56, -inf  ;;  %v804_v47 = vsel %vm803_vm7, %v765_v54, %v802_v37 }
 0x126   :  { %v807_v58 = vsel %vm805_vm14, %v806_v51, %v804_v47  ;;  %v853_v26 = vsel %vm852_vm15, %v772_v44, %v851_v59 }
 0x127   :  { %v876_v28 = vsel %vm857_vm8, %v807_v58, inf  ;;  %v930_v61 = vsel %vm857_vm8, %v807_v58, -inf  ;;  %v1060_v10 = vpop.eup %1059  ;;  %v856_v57 = vsel %vm854_vm0, %v855_v43, %v853_v26 }
 0x128   :  { %v878_v1 = vmin.f32 %v876_v28, %v877_v40  ;;  %v932_v14 = vmax.f32 %v930_v61, %v931_v20  ;;  %v844_v62 = vmul.f32 %v1060_v10, %v771_v7  ;;  %v904_v24 = vsel %vm857_vm8, %v856_v57, inf }
 0x129   :  { %v958_v0 = vsel %vm857_vm8, %v856_v57, -inf }
 0x12a   :  { %v879_v31 = vrot.slane %v878_v1, 4  ;;  %v933_v2 = vrot.slane %v932_v14, 4  ;;  %v846_v17 = vsel %vm845_vm1, %v771_v7, %v844_v62 }
 0x12b   :  { %v849_v60 = vsel %vm847_vm2, %v848_v34, %v846_v17 }
 0x12c   :  { %v880_v52 = vmin.f32 %v878_v1, %v879_v31  ;;  %v934_v38 = vmax.f32 %v932_v14, %v933_v2  ;;  %v903_v33 = vsel %vm857_vm8, %v849_v60, inf  ;;  %v957_v8 = vsel %vm857_vm8, %v849_v60, -inf }
 0x12d   :  { %v905_v27 = vmin.f32 %v903_v33, %v904_v24  ;;  %v959_v22 = vmax.f32 %v957_v8, %v958_v0  ;;  %vm977_vm8 = vcmask 1042434  }
 0x12e   :  { %v881_v35 = vrot.slane %v880_v52, 2  ;;  %v935_v41 = vrot.slane %v934_v38, 2 }
 0x12f   :  { %v906_v53 = vrot.slane %v905_v27, 4  ;;  %v960_v25 = vrot.slane %v959_v22, 4 }
 0x130   :  { %v882_v4 = vmin.f32 %v880_v52, %v881_v35  ;;  %v936_v36 = vmax.f32 %v934_v38, %v935_v41 }
 0x131   :  { %v907_v12 = vmin.f32 %v905_v27, %v906_v53  ;;  %v961_v9 = vmax.f32 %v959_v22, %v960_v25 }
 0x132   :  { %v883_v49 = vrot.slane %v882_v4, 1  ;;  %v937_v15 = vrot.slane %v936_v36, 1 }
 0x133   :  { %v908_v45 = vrot.slane %v907_v12, 2  ;;  %v962_v3 = vrot.slane %v961_v9, 2 }
 0x134   :  { %v884_v16 = vmin.f32 %v882_v4, %v883_v49  ;;  %v938_v54 = vmax.f32 %v936_v36, %v937_v15 }
 0x135   :  { %v909_v21 = vmin.f32 %v907_v12, %v908_v45  ;;  %v963_v5 = vmax.f32 %v961_v9, %v962_v3 }
 0x137   :  { %v910_v6 = vrot.slane %v909_v21, 1  ;;  %v964_v39 = vrot.slane %v963_v5, 1 }
 0x139   :  { %v911_v48 = vmin.f32 %v909_v21, %v910_v6  ;;  %v965_v23 = vmax.f32 %v963_v5, %v964_v39 }
 0x13b   :  { %v968_v18 = vmin.f32 %v884_v16, %v911_v48  ;;  %v971_v13 = vmax.f32 %v938_v54, %v965_v23 }
 0x13d   :  { %v978_v29 = vsel %vm977_vm8, %v968_v18, %v1794_v42  ;;  %v986_v44 = vsel %vm977_vm8, %v971_v13, %v1796_v46 }
 0x13e   :  { %981 = vst.msk [vmem:[%s1817_s3] sm:$0x7] %vm980_vm3, %v978_v29  ;;  %988 = vst.msk [vmem:[%s1818_s4] sm:$0x7] %vm980_vm3, %v986_v44 }
 0x13f   :  { %997 = vsyncpa [#allocation3], 1 }
 0x140   :  { %998 = vsyncpa [#allocation5], 1 }

// kernel: gradient_forward.3
= control target key start
LH: loop header
LB: loop body
LE: loop exit
PB: predicated region body
PF: predicated region fallthrough
CT: control target
= control target key end

     0   :  { %9 = vsyncpa [#allocation4], 0  ;;  %s1946_s0 = inlined_call_operand.vmem [shape: f32[2,3], index: 0, kind: input, shape index: {}]   ;;  %s1947_s1 = inlined_call_operand.vmem [shape: f32[2,4,16,16], index: 1, kind: input, shape index: {}, may-alias: {1,2,3}]   ;;  %s1948_s2 = inlined_call_operand.vmem [shape: f32[2,4,16,16], index: 2, kind: input, shape index: {}, may-alias: {1,2,3}]   ;;  %s1949_s3 = inlined_call_operand.vmem [shape: f32[2,4,16,16], index: 3, kind: input, shape index: {}, may-alias: {1,2,3}]   ;;  %s1950_s4 = inlined_call_operand.hbm [shape: f32[2,3,16,16], index: 4, kind: output, shape index: {}]  }
   0x1   :  { %10 = vsyncpa [#allocation3], 0  ;;  %s17_s17 = sshll.u32 %s1946_s0, 4  ;;  %v1142_v0 = vld [vmem:[%s1947_s1] sm:$0xff]  ;;  %v1147_v1 = vld [vmem:[%s1947_s1 + $0x8] sm:$0xff]  ;;  %s18_s17 = int_to_ptr.vmem [resolvable:$true] %s17_s17 }
   0x2   :  { %v1152_v2 = vld [vmem:[%s1947_s1 + $0x10] sm:$0xff]  ;;  %v1157_v3 = vld [vmem:[%s1947_s1 + $0x18] sm:$0xff]  ;;  %v1162_v4 = vld [vmem:[%s1947_s1 + $0x20] sm:$0xff]  ;;  %s1067_s27 = scalar_lea.vmem %s18_s17, 32  ;;  %p1072_p1 = scmp.lt.s32.totalorder %s18_s17, %s18_s17 }
   0x3   :  { %p1068_p0 = scmp.ne.s32.totalorder %s18_s17, %s1067_s27  ;;  %p1073_p2 = scmp.lt.s32.totalorder %s1067_s27, %s1067_s27 }
   0x5   :  { %p1074_p3 = por %p1073_p2, %p1072_p1 }
   0x7   :  { %p1075_p4 = pnand %p1074_p3, %p1068_p0 }
   0x9   :  { %1078 = shalt.err (!%p1075_p4)
}
   0xa   :  { %s1105_s28 = smov [#allocation2]   ;;  %v1167_v5 = vld [vmem:[%s1947_s1 + $0x28] sm:$0xff]  ;;  %v1172_v6 = vld [vmem:[%s1947_s1 + $0x40] sm:$0xff]  ;;  %v1182_v8 = vld [vmem:[%s1947_s1 + $0x50] sm:$0xff] }
   0xb   :  { %20 = dma.vmem_to_smem %s18_s17, 32, %s1105_s28, [#allocation4]   ;;  %v1177_v7 = vld [vmem:[%s1947_s1 + $0x48] sm:$0xff]  ;;  %v1187_v9 = vld [vmem:[%s1947_s1 + $0x58] sm:$0xff]  ;;  %v1192_v10 = vld [vmem:[%s1947_s1 + $0x60] sm:$0xff] }
   0xc   :  { %v1197_v11 = vld [vmem:[%s1947_s1 + $0x68] sm:$0xff]  ;;  %v144_v12 = vld [vmem:[%s1948_s2] sm:$0xff]  ;;  %v146_v13 = vld [vmem:[%s1948_s2 + $0x10] sm:$0xff] }
   0xd   :  { %145 = vst [vmem:[#allocation6] sm:$0xff] %v144_v12  ;;  %147 = vst [vmem:[#allocation6 + $0x8] sm:$0xff] %v146_v13  ;;  %v148_v14 = vld [vmem:[%s1948_s2 + $0x20] sm:$0xff]  ;;  %v152_v16 = vld [vmem:[%s1948_s2 + $0x50] sm:$0xff] }
   0xe   :  { %v150_v15 = vld [vmem:[%s1948_s2 + $0x40] sm:$0xff]  ;;  %149 = vst [vmem:[#allocation6 + $0x10] sm:$0xff] %v148_v14  ;;  %153 = vst [vmem:[#allocation6 + $0x20] sm:$0xff] %v152_v16  ;;  %v1026_v18 = vld [vmem:[%s1949_s3 + $0x8] sm:$0xff] }
   0xf   :  { %151 = vst [vmem:[#allocation6 + $0x18] sm:$0xff] %v150_v15  ;;  %v154_v17 = vld [vmem:[%s1948_s2 + $0x60] sm:$0xff]  ;;  %v1027_v19 = vld [vmem:[%s1949_s3 + $0x18] sm:$0xff]  ;;  %205 = vst [vmem:[#allocation7] sm:$0xff] %v1026_v18 }
  0x10   :  { %155 = vst [vmem:[#allocation6 + $0x28] sm:$0xff] %v154_v17  ;;  %207 = vst [vmem:[#allocation7 + $0x8] sm:$0xff] %v1027_v19  ;;  %v1028_v20 = vld [vmem:[%s1949_s3 + $0x28] sm:$0xff]  ;;  %v1030_v22 = vld [vmem:[%s1949_s3 + $0x58] sm:$0xff] }
  0x11   :  { %v1029_v21 = vld [vmem:[%s1949_s3 + $0x48] sm:$0xff]  ;;  %209 = vst [vmem:[#allocation7 + $0x10] sm:$0xff] %v1028_v20  ;;  %213 = vst [vmem:[#allocation7 + $0x20] sm:$0xff] %v1030_v22 }
  0x12   :  { %211 = vst [vmem:[#allocation7 + $0x18] sm:$0xff] %v1029_v21  ;;  %v1031_v23 = vld [vmem:[%s1949_s3 + $0x68] sm:$0xff] }
  0x13   :  { %215 = vst [vmem:[#allocation7 + $0x28] sm:$0xff] %v1031_v23 }
  0x14   :  { %1101 = dma.done.wait [#allocation4], 32  }
  0x15   :  { %1102 = vsyncadd [#allocation4], 4294967264 }
  0x16   :  { %228 = sfence }
  0x17   :  { %v254_v24 = vld [vmem:[#allocation6 + $0xf] sm:$0x1]  ;;  %vm291_vm0 = vcmask 1040384   ;;  %v295_v25 = vrot.slane %v1152_v2, 7  ;;  %v328_v26 = vlaneseq  ;;  %vm369_vm1 = vcmask 1046528   ;;  %s1106_s3 = smov 1  }
  0x18   :  { %v373_v27 = vrot.slane %v1152_v2, 1  ;;  %v374_v28 = vrot.slane %v1157_v3, 1  ;;  %v253_v29 = vld [vmem:[#allocation6 + $0x7] sm:$0x1]  ;;  %v292_v30 = vrot.slane %v1142_v0, 7  ;;  %v261_v31 = vmul.f32 0.0, %v254_v24 }
  0x19   :  { %v1240_v32 = vshrl.u32 %v328_v26, 7  ;;  %v260_v33 = vmul.f32 0.0, %v253_v29  ;;  %v267_v34 = vld [vmem:[#allocation7 + $0x8] sm:$0x1]  ;;  %v323_v35 = vsel %vm291_vm0, 0.0, %v295_v25  ;;  %v370_v36 = vrot.slane %v1142_v0, 1 }
  0x1a   :  { %v371_v37 = vrot.slane %v1147_v1, 1  ;;  %v266_v38 = vld [vmem:[#allocation7] sm:$0x1]  ;;  %v1250_v40 = vsel %vm369_vm1, %v373_v27, %v374_v28  ;;  %v322_v41 = vsel %vm291_vm0, 0.0, %v292_v30  ;;  %v274_v43 = vmul.f32 0.0, %v267_v34  ;;  %s1107_s12 = smov 127  }
  0x1b   :  { %vm331_vm2 = vcmp.eq.s32.totalorder %v1240_v32, 0  ;;  %v1247_v39 = vsub.s32 0, %v1240_v32  ;;  %v296_v44 = vrot.slane %v1157_v3, 7  ;;  %v1258_v45 = vadd.s32 8, %v1240_v32  ;;  %v268_v53 = vld [vmem:[#allocation7 + $0x10] sm:$0x1] }
  0x1c   :  { %v1254_v42 = vsel %vm369_vm1, %v370_v36, %v371_v37  ;;  %v401_v48 = vsel %vm369_vm1, %v374_v28, 0.0  ;;  %v273_v49 = vmul.f32 0.0, %v266_v38  ;;  %v293_v52 = vrot.slane %v1147_v1, 7  ;;  %v255_v58 = vld [vmem:[#allocation6 + $0x17] sm:$0x1]  ;;  %s942_s13 = sld [smem:[#allocation2]] }
  0x1d   :  { %v340_v46 = vrot.slane %v261_v31, %v1247_v39  ;;  %v336_v47 = vrot.slane %v260_v33, %v1247_v39  ;;  %v1264_v50 = vsel %vm291_vm0, %v295_v25, %v296_v44  ;;  %vm407_vm3 = vcmp.eq.s32.totalorder %v1258_v45, 15  ;;  %v269_v63 = vld [vmem:[#allocation7 + $0x18] sm:$0x1]  ;;  %v256_v24 = vld [vmem:[#allocation6 + $0x1f] sm:$0x1]  ;;  %s1032_s14 = sld [smem:[#allocation2 + $0x80]] }
  0x1e   :  { %v415_v51 = vrot.slane %v274_v43, %v1247_v39  ;;  %v400_v56 = vsel %vm369_vm1, %v371_v37, 0.0  ;;  %v411_v57 = vrot.slane %v273_v49, %v1247_v39  ;;  %v1292_v62 = vsel %vm291_vm0, %v292_v30, %v293_v52  ;;  %s1033_s15 = sld [smem:[#allocation2 + $0x1]]  ;;  %s1035_s17 = sld [smem:[#allocation2 + $0x2]] }
  0x1f   :  { %v1271_v54 = vsel %vm331_vm2, %v340_v46, %v323_v35  ;;  %v1275_v55 = vsel %vm331_vm2, %v336_v47, %v322_v41  ;;  %v275_v14 = vmul.f32 0.0, %v268_v53  ;;  %v298_v15 = vrot.slane %v1162_v4, 7  ;;  %v270_v35 = vld [vmem:[#allocation7 + $0x20] sm:$0x1]  ;;  %s1034_s16 = sld [smem:[#allocation2 + $0x81]]  ;;  %s1036_s18 = sld [smem:[#allocation2 + $0x82]] }
  0x20   :  { %v1281_v59 = vsub.f32 %v1271_v54, %v1250_v40  ;;  %v1285_v60 = vsub.f32 %v1275_v55, %v1254_v42  ;;  %v1289_v61 = vsel %vm407_vm3, %v415_v51, %v401_v48  ;;  %v1300_v13 = vsel %vm407_vm3, %v411_v57, %v400_v56  ;;  %v257_v48 = vld [vmem:[#allocation6 + $0x27] sm:$0x1]  ;;  %s1108_s19 = smov [#allocation8]  }
  0x21   :  { %v1296_v12 = vsub.f32 %v1264_v50, %v1289_v61  ;;  %v1309_v16 = vsub.f32 %v1292_v62, %v1300_v13  ;;  %v299_v17 = vrot.slane %v1167_v5, 7  ;;  %v377_v18 = vrot.slane %v1167_v5, 1  ;;  %s998_s20 = sshll.u32 %s1108_s19, 4  ;;  %s999_s20 = int_to_ptr.vmem [resolvable:$true] %s998_s20 }
  0x22   :  { %508 = vrot.lane.b32.xlu1 %v1281_v59, %s1106_s3  ;;  %504 = vrot.lane.b32.xlu0 %v1285_v60, %s1106_s3  ;;  %v262_v19 = vmul.f32 0.0, %v255_v58  ;;  %v419_v20 = vrot.slane %v275_v14, %v1247_v39  ;;  %v324_v21 = vsel %vm291_vm0, 0.0, %v298_v15  ;;  %v376_v22 = vrot.slane %v1162_v4, 1  ;;  %v271_v14 = vld [vmem:[#allocation7 + $0x28] sm:$0x1]  ;;  %s1079_s21 = scalar_lea.vmem %s999_s20, 1536  ;;  %p1084_p6 = scmp.lt.s32.totalorder %s999_s20, %s999_s20 }
  0x23   :  { %v276_v23 = vmul.f32 0.0, %v269_v63  ;;  %v1317_v25 = vsel %vm291_vm0, %v298_v15, %v299_v17  ;;  %v402_v27 = vsel %vm369_vm1, %v377_v18, 0.0  ;;  %v301_v29 = vrot.slane %v1172_v6, 7  ;;  %p1080_p5 = scmp.ne.s32.totalorder %s999_s20, %s1079_s21  ;;  %p1085_p7 = scmp.lt.s32.totalorder %s1079_s21, %s1079_s21 }
  0x24   :  { %v344_v28 = vrot.slane %v262_v19, %v1247_v39  ;;  %v1324_v30 = vsel %vm407_vm3, %v419_v20, %v402_v27  ;;  %v1327_v31 = vsel %vm369_vm1, %v376_v22, %v377_v18  ;;  %v302_v33 = vrot.slane %v1177_v7, 7 }
  0x25   :  { %v380_v34 = vrot.slane %v1177_v7, 1  ;;  %v1337_v36 = vsub.f32 %v1317_v25, %v1324_v30  ;;  %v423_v38 = vrot.slane %v276_v23, %v1247_v39  ;;  %v263_v41 = vmul.f32 0.0, %v256_v24  ;;  %v258_v24 = vld [vmem:[#allocation6 + $0x2f] sm:$0x1]  ;;  %p1086_p8 = por %p1085_p7, %p1084_p6 }
  0x26   :  { %510 = vrot.lane.b32.xlu1 %v1296_v12, %s1106_s3  ;;  %506 = vrot.lane.b32.xlu0 %v1309_v16, %s1106_s3  ;;  %v1341_v37 = vsel %vm331_vm2, %v344_v28, %v324_v21  ;;  %v1349_v44 = vsel %vm291_vm0, %v301_v29, %v302_v33  ;;  %v325_v47 = vsel %vm291_vm0, 0.0, %v301_v29  ;;  %v379_v52 = vrot.slane %v1172_v6, 1 }
  0x27   :  { %v1346_v43 = vsub.f32 %v1341_v37, %v1327_v31  ;;  %v403_v46 = vsel %vm369_vm1, %v380_v34, 0.0  ;;  %v348_v51 = vrot.slane %v263_v41, %v1247_v39  ;;  %v277_v53 = vmul.f32 0.0, %v270_v35  ;;  %p1087_p9 = pnand %p1086_p8, %p1080_p5 }
  0x28   :  { %v1355_v49 = vsel %vm407_vm3, %v423_v38, %v403_v46  ;;  %v304_v57 = vrot.slane %v1182_v8, 7  ;;  %v305_v58 = vrot.slane %v1187_v9, 7  ;;  %v383_v63 = vrot.slane %v1187_v9, 1 }
  0x29   :  { %v1361_v56 = vsub.f32 %v1349_v44, %v1355_v49  ;;  %v1372_v15 = vsel %vm331_vm2, %v348_v51, %v325_v47  ;;  %v1375_v17 = vsel %vm369_vm1, %v379_v52, %v380_v34  ;;  %v427_v18 = vrot.slane %v277_v53, %v1247_v39 }
  0x2a   :  { %514 = vrot.lane.b32.xlu1 %v1337_v36, %s1106_s3  ;;  %512 = vrot.lane.b32.xlu0 %v1346_v43, %s1106_s3  ;;  %v264_v19 = vmul.f32 0.0, %v257_v48  ;;  %v1380_v20 = vsub.f32 %v1372_v15, %v1375_v17  ;;  %v1383_v21 = vsel %vm291_vm0, %v304_v57, %v305_v58  ;;  %v404_v22 = vsel %vm369_vm1, %v383_v63, 0.0 }
  0x2b   :  { %v326_v23 = vsel %vm291_vm0, 0.0, %v304_v57  ;;  %v1389_v27 = vsel %vm407_vm3, %v427_v18, %v404_v22  ;;  %v382_v29 = vrot.slane %v1182_v8, 1  ;;  %v278_v33 = vmul.f32 0.0, %v271_v14 }
  0x2c   :  { %v352_v28 = vrot.slane %v264_v19, %v1247_v39  ;;  %v1395_v34 = vsub.f32 %v1383_v21, %v1389_v27  ;;  %v307_v35 = vrot.slane %v1192_v10, 7  ;;  %v308_v38 = vrot.slane %v1197_v11, 7 }
  0x2d   :  { %v386_v41 = vrot.slane %v1197_v11, 1  ;;  %v1407_v47 = vsel %vm369_vm1, %v382_v29, %v383_v63  ;;  %v431_v48 = vrot.slane %v278_v33, %v1247_v39  ;;  %v265_v51 = vmul.f32 0.0, %v258_v24 }
  0x2e   :  { %518 = vrot.lane.b32.xlu1 %v1361_v56, %s1106_s3  ;;  %516 = vrot.lane.b32.xlu0 %v1380_v20, %s1106_s3  ;;  %v365_v46 = vsel %vm331_vm2, %v352_v28, %v326_v23  ;;  %v309_v53 = vsel %vm291_vm0, %v307_v35, %v308_v38  ;;  %v327_v58 = vsel %vm291_vm0, 0.0, %v307_v35  ;;  %v385_v63 = vrot.slane %v1192_v10, 1 }
  0x2f   :  { %v1411_v52 = vsub.f32 %v365_v46, %v1407_v47  ;;  %v405_v57 = vsel %vm369_vm1, %v386_v41, 0.0  ;;  %v356_v18 = vrot.slane %v265_v51, %v1247_v39  ;;  %v457_v32 = vadd.f32 %v1292_v62, %v1147_v1 }
  0x30   :  { %v1418_v14 = vsel %vm407_vm3, %v431_v48, %v405_v57  ;;  %v387_v45 = vsel %vm369_vm1, %v385_v63, %v386_v41  ;;  %v456_v39 = vadd.f32 %v1275_v55, %v1142_v0  ;;  %v459_v28 = vadd.f32 %v1264_v50, %v1157_v3 }
  0x31   :  { %v1427_v19 = vsub.f32 %v309_v53, %v1418_v14  ;;  %v367_v22 = vsel %vm331_vm2, %v356_v18, %v327_v58  ;;  %v469_v24 = vadd.f32 %v457_v32, %v1147_v1  ;;  %v458_v29 = vadd.f32 %v1271_v54, %v1152_v2 }
  0x32   :  { %522 = vrot.lane.b32.xlu1 %v1395_v34, %s1106_s3  ;;  %520 = vrot.lane.b32.xlu0 %v1411_v52, %s1106_s3  ;;  %v1432_v23 = vsub.f32 %v367_v22, %v387_v45  ;;  %v468_v62 = vadd.f32 %v456_v39, %v1142_v0  ;;  %v471_v55 = vadd.f32 %v459_v28, %v1157_v3  ;;  %vm540_vm4 = vcmask 7168  }
  0x33   :  { %v481_v33 = vadd.f32 %v469_v24, %v1300_v13  ;;  %v470_v1 = vadd.f32 %v458_v29, %v1152_v2  ;;  %v461_v54 = vadd.f32 %v1317_v25, %v1167_v5  ;;  %v460_v0 = vadd.f32 %v1341_v37, %v1162_v4 }
  0x34   :  { %v480_v50 = vadd.f32 %v468_v62, %v1254_v42  ;;  %v483_v13 = vadd.f32 %v471_v55, %v1289_v61  ;;  %v463_v3 = vadd.f32 %v1349_v44, %v1177_v7  ;;  %v462_v2 = vadd.f32 %v1372_v15, %v1172_v6 }
  0x35   :  { %v482_v42 = vadd.f32 %v470_v1, %v1250_v40  ;;  %v473_v35 = vadd.f32 %v461_v54, %v1167_v5  ;;  %v472_v25 = vadd.f32 %v460_v0, %v1162_v4  ;;  %v465_v44 = vadd.f32 %v1383_v21, %v1187_v9 }
  0x36   :  { %526 = vrot.lane.b32.xlu1 %v1427_v19, %s1106_s3  ;;  %524 = vrot.lane.b32.xlu0 %v1432_v23, %s1106_s3  ;;  %v475_v37 = vadd.f32 %v463_v3, %v1177_v7  ;;  %v474_v61 = vadd.f32 %v462_v2, %v1172_v6  ;;  %v464_v40 = vadd.f32 %v365_v46, %v1182_v8  ;;  %vm628_vm6 = vcmask 121856  }
  0x37   :  { %v485_v15 = vadd.f32 %v473_v35, %v1324_v30  ;;  %v484_v38 = vadd.f32 %v472_v25, %v1327_v31  ;;  %v467_v4 = vadd.f32 %v309_v53, %v1197_v11  ;;  %v466_v7 = vadd.f32 %v367_v22, %v1192_v10 }
  0x38   :  { %v487_v5 = vadd.f32 %v475_v37, %v1355_v49  ;;  %v486_v6 = vadd.f32 %v474_v61, %v1375_v17  ;;  %v477_v21 = vadd.f32 %v465_v44, %v1187_v9  ;;  %v476_v30 = vadd.f32 %v464_v40, %v1182_v8 }
  0x39   :  { %v479_v31 = vadd.f32 %v467_v4, %v1197_v11  ;;  %v478_v46 = vadd.f32 %v466_v7, %v1192_v10  ;;  %v1531_v8 = vand.u32 127, %v328_v26  ;;  %vm954_vm10 = vcmask 130048  }
  0x3a   :  { %594 = vrot.lane.b32.xlu1 %v1309_v16, %s1107_s12  ;;  %592 = vrot.lane.b32.xlu0 %v1285_v60, %s1107_s12  ;;  %v489_v49 = vadd.f32 %v477_v21, %v1389_v27  ;;  %v488_v41 = vadd.f32 %v476_v30, %v1407_v47 }
  0x3b   :  { %v491_v9 = vadd.f32 %v479_v31, %v1418_v14  ;;  %v490_v17 = vadd.f32 %v478_v46, %v387_v45  ;;  %vm555_vm5 = vcmp.eq.s32.totalorder %v1531_v8, 0  ;;  %vm641_vm7 = vcmp.eq.s32.totalorder %v1531_v8, 15 }
  0x3e   :  { %598 = vrot.lane.b32.xlu1 %v1296_v12, %s1107_s12  ;;  %596 = vrot.lane.b32.xlu0 %v1281_v59, %s1107_s12 }
  0x42   :  { %602 = vrot.lane.b32.xlu1 %v1337_v36, %s1107_s12  ;;  %600 = vrot.lane.b32.xlu0 %v1346_v43, %s1107_s12 }
  0x46   :  { %606 = vrot.lane.b32.xlu1 %v1361_v56, %s1107_s12  ;;  %604 = vrot.lane.b32.xlu0 %v1380_v20, %s1107_s12 }
  0x4a   :  { %610 = vrot.lane.b32.xlu1 %v1395_v34, %s1107_s12  ;;  %608 = vrot.lane.b32.xlu0 %v1411_v52, %s1107_s12 }
  0x4e   :  { %614 = vrot.lane.b32.xlu1 %v1427_v19, %s1107_s12  ;;  %612 = vrot.lane.b32.xlu0 %v1432_v23, %s1107_s12 }
  0x52   :  { %680 = vrot.lane.b32.xlu1 %v481_v33, %s1107_s12  ;;  %678 = vrot.lane.b32.xlu0 %v480_v50, %s1107_s12 }
  0x56   :  { %684 = vrot.lane.b32.xlu1 %v483_v13, %s1107_s12  ;;  %682 = vrot.lane.b32.xlu0 %v482_v42, %s1107_s12 }
  0x5a   :  { %688 = vrot.lane.b32.xlu1 %v485_v15, %s1107_s12  ;;  %686 = vrot.lane.b32.xlu0 %v484_v38, %s1107_s12 }
  0x5e   :  { %692 = vrot.lane.b32.xlu1 %v487_v5, %s1107_s12  ;;  %690 = vrot.lane.b32.xlu0 %v486_v6, %s1107_s12 }
  0x62   :  { %696 = vrot.lane.b32.xlu1 %v489_v49, %s1107_s12  ;;  %694 = vrot.lane.b32.xlu0 %v488_v41, %s1107_s12 }
  0x66   :  { %700 = vrot.lane.b32.xlu1 %v491_v9, %s1107_s12  ;;  %698 = vrot.lane.b32.xlu0 %v490_v17, %s1107_s12 }
  0x6a   :  { %740 = vrot.lane.b32.xlu1 %v481_v33, %s1106_s3  ;;  %738 = vrot.lane.b32.xlu0 %v480_v50, %s1106_s3 }
  0x6e   :  { %744 = vrot.lane.b32.xlu1 %v483_v13, %s1106_s3  ;;  %742 = vrot.lane.b32.xlu0 %v482_v42, %s1106_s3 }
  0x72   :  { %748 = vrot.lane.b32.xlu1 %v485_v15, %s1106_s3  ;;  %746 = vrot.lane.b32.xlu0 %v484_v38, %s1106_s3 }
  0x76   :  { %752 = vrot.lane.b32.xlu1 %v487_v5, %s1106_s3  ;;  %750 = vrot.lane.b32.xlu0 %v486_v6, %s1106_s3 }
  0x7a   :  { %756 = vrot.lane.b32.xlu1 %v489_v49, %s1106_s3  ;;  %754 = vrot.lane.b32.xlu0 %v488_v41, %s1106_s3 }
  0x7e   :  { %760 = vrot.lane.b32.xlu1 %v491_v9, %s1106_s3  ;;  %758 = vrot.lane.b32.xlu0 %v490_v17, %s1106_s3 }
  0x94   :  { %v509_v10 = vpop.permute.xlu1 %508  ;;  %v505_v11 = vpop.permute.xlu0 %504 }
  0x95   :  { %v543_v27 = vsel %vm540_vm4, 0.0, %v509_v10  ;;  %v541_v47 = vsel %vm540_vm4, 0.0, %v505_v11 }
  0x96   :  { %v558_v48 = vsel %vm555_vm5, 0.0, %v543_v27  ;;  %v556_v51 = vsel %vm555_vm5, 0.0, %v541_v47 }
  0x97   :  { %v568_v42 = vadd.f32 %v556_v51, %v1285_v60  ;;  %v570_v38 = vadd.f32 %v558_v48, %v1281_v59 }
  0x98   :  { %v511_v53 = vpop.permute.xlu1 %510  ;;  %v1540_v57 = vpop.permute.xlu0 %506 }
  0x99   :  { %v544_v26 = vsel %vm540_vm4, 0.0, %v511_v53  ;;  %v580_v5 = vadd.f32 %v568_v42, %v1285_v60  ;;  %v582_v9 = vadd.f32 %v570_v38, %v1281_v59 }
  0x9a   :  { %v559_v58 = vsel %vm555_vm5, 0.0, %v544_v26 }
  0x9b   :  { %v571_v40 = vadd.f32 %v559_v58, %v1296_v12 }
  0x9c   :  { %v515_v14 = vpop.permute.xlu1 %514  ;;  %v513_v18 = vpop.permute.xlu0 %512 }
  0x9d   :  { %v546_v63 = vsel %vm540_vm4, 0.0, %v515_v14  ;;  %v545_v22 = vsel %vm540_vm4, 0.0, %v513_v18  ;;  %v583_v41 = vadd.f32 %v571_v40, %v1296_v12 }
  0x9e   :  { %v561_v45 = vsel %vm555_vm5, 0.0, %v546_v63  ;;  %v560_v32 = vsel %vm555_vm5, 0.0, %v545_v22 }
  0x9f   :  { %v573_v21 = vadd.f32 %v561_v45, %v1337_v36  ;;  %v572_v30 = vadd.f32 %v560_v32, %v1346_v43 }
  0xa0   :  { %v519_v39 = vpop.permute.xlu1 %518  ;;  %v517_v24 = vpop.permute.xlu0 %516 }
  0xa1   :  { %v548_v28 = vsel %vm540_vm4, 0.0, %v519_v39  ;;  %v547_v29 = vsel %vm540_vm4, 0.0, %v517_v24  ;;  %v585_v47 = vadd.f32 %v573_v21, %v1337_v36  ;;  %v584_v12 = vadd.f32 %v572_v30, %v1346_v43 }
  0xa2   :  { %v563_v62 = vsel %vm555_vm5, 0.0, %v548_v28  ;;  %v562_v33 = vsel %vm555_vm5, 0.0, %v547_v29 }
  0xa3   :  { %v575_v59 = vadd.f32 %v563_v62, %v1361_v56  ;;  %v574_v53 = vadd.f32 %v562_v33, %v1380_v20 }
  0xa4   :  { %v523_v55 = vpop.permute.xlu1 %522  ;;  %v521_v1 = vpop.permute.xlu0 %520 }
  0xa5   :  { %v550_v50 = vsel %vm540_vm4, 0.0, %v523_v55  ;;  %v549_v54 = vsel %vm540_vm4, 0.0, %v521_v1  ;;  %v587_v39 = vadd.f32 %v575_v59, %v1361_v56  ;;  %v586_v28 = vadd.f32 %v574_v53, %v1380_v20 }
  0xa6   :  { %v565_v0 = vsel %vm555_vm5, 0.0, %v550_v50  ;;  %v564_v13 = vsel %vm555_vm5, 0.0, %v549_v54 }
  0xa7   :  { %v577_v43 = vadd.f32 %v565_v0, %v1395_v34  ;;  %v576_v22 = vadd.f32 %v564_v13, %v1411_v52 }
  0xa8   :  { %v527_v3 = vpop.permute.xlu1 %526  ;;  %v525_v2 = vpop.permute.xlu0 %524 }
  0xa9   :  { %v552_v35 = vsel %vm540_vm4, 0.0, %v527_v3  ;;  %v551_v25 = vsel %vm540_vm4, 0.0, %v525_v2  ;;  %v589_v50 = vadd.f32 %v577_v43, %v1395_v34  ;;  %v588_v56 = vadd.f32 %v576_v22, %v1411_v52 }
  0xaa   :  { %v567_v37 = vsel %vm555_vm5, 0.0, %v552_v35  ;;  %v566_v61 = vsel %vm555_vm5, 0.0, %v551_v25  ;;  %v1679_v43 = vstv %s1035_s17 }
  0xab   :  { %v579_v20 = vadd.f32 %v567_v37, %v1427_v19  ;;  %v578_v13 = vadd.f32 %v566_v61, %v1432_v23 }
  0xac   :  { %v1571_v44 = vpop.permute.xlu1 %594  ;;  %v593_v15 = vpop.permute.xlu0 %592 }
  0xad   :  { %v629_v4 = vsel %vm628_vm6, %v593_v15, 0.0  ;;  %v591_v37 = vadd.f32 %v579_v20, %v1427_v19  ;;  %v590_v38 = vadd.f32 %v578_v13, %v1432_v23 }
  0xae   :  { %v642_v7 = vsel %vm641_vm7, 0.0, %v629_v4 }
  0xaf   :  { %v1579_v6 = vadd.f32 %v642_v7, %v580_v5 }
  0xb0   :  { %v599_v31 = vpop.permute.xlu1 %598  ;;  %v597_v49 = vpop.permute.xlu0 %596 }
  0xb1   :  { %v632_v46 = vsel %vm628_vm6, %v599_v31, 0.0  ;;  %v631_v60 = vsel %vm628_vm6, %v597_v49, 0.0 }
  0xb2   :  { %v645_v17 = vsel %vm641_vm7, 0.0, %v632_v46  ;;  %v644_v10 = vsel %vm641_vm7, 0.0, %v631_v60 }
  0xb3   :  { %v1591_v11 = vadd.f32 %v645_v17, %v583_v41  ;;  %v1593_v27 = vadd.f32 %v644_v10, %v582_v9  ;;  %v542_v41 = vsel %vm540_vm4, 0.0, %v1540_v57 }
  0xb4   :  { %v603_v48 = vpop.permute.xlu1 %602  ;;  %v601_v51 = vpop.permute.xlu0 %600  ;;  %v557_v9 = vsel %vm555_vm5, 0.0, %v542_v41 }
  0xb5   :  { %v634_v26 = vsel %vm628_vm6, %v603_v48, 0.0  ;;  %v633_v58 = vsel %vm628_vm6, %v601_v51, 0.0  ;;  %v569_v10 = vadd.f32 %v557_v9, %v1309_v16 }
  0xb6   :  { %v647_v14 = vsel %vm641_vm7, 0.0, %v634_v26  ;;  %v646_v18 = vsel %vm641_vm7, 0.0, %v633_v58  ;;  %v1673_v58 = vstv %s1032_s14 }
  0xb7   :  { %v1605_v63 = vadd.f32 %v647_v14, %v585_v47  ;;  %v1607_v36 = vadd.f32 %v646_v18, %v584_v12  ;;  %v630_v47 = vsel %vm628_vm6, %v1571_v44, 0.0  ;;  %v581_v51 = vadd.f32 %v569_v10, %v1309_v16 }
  0xb8   :  { %v607_v45 = vpop.permute.xlu1 %606  ;;  %v605_v32 = vpop.permute.xlu0 %604  ;;  %v643_v57 = vsel %vm641_vm7, 0.0, %v630_v47  ;;  %v1671_v44 = vstv %s942_s13  ;;  %v1675_v14 = vstv %s1033_s15  ;;  %v1677_v18 = vstv %s1034_s16 }
  0xb9   :  { %v636_v24 = vsel %vm628_vm6, %v607_v45, 0.0  ;;  %v635_v29 = vsel %vm628_vm6, %v605_v32, 0.0  ;;  %v655_v59 = vadd.f32 %v643_v57, %v581_v51  ;;  %v1683_v32 = vstv %s1036_s18 }
  0xba   :  { %v649_v62 = vsel %vm641_vm7, 0.0, %v636_v24  ;;  %v648_v33 = vsel %vm641_vm7, 0.0, %v635_v29  ;;  %v813_v24 = vmul.f32 %v1591_v11, %v1591_v11  ;;  %v1693_v29 = vmul.f32 %v1605_v63, %v1605_v63 }
  0xbb   :  { %v1619_v55 = vadd.f32 %v649_v62, %v587_v39  ;;  %v1621_v1 = vadd.f32 %v648_v33, %v586_v28  ;;  %v811_v22 = vmul.f32 %v655_v59, %v655_v59  ;;  %v810_v39 = vmul.f32 %v1579_v6, %v1579_v6 }
  0xbc   :  { %v611_v54 = vpop.permute.xlu1 %610  ;;  %v609_v0 = vpop.permute.xlu0 %608  ;;  %v812_v28 = vmul.f32 %v1593_v27, %v1593_v27  ;;  %v1709_v20 = vmul.f32 %v1607_v36, %v1607_v36 }
  0xbd   :  { %v638_v3 = vsel %vm628_vm6, %v611_v54, 0.0  ;;  %v637_v2 = vsel %vm628_vm6, %v609_v0, 0.0  ;;  %v1713_v13 = vmul.f32 %v1619_v55, %v1619_v55 }
  0xbe   :  { %v651_v42 = vsel %vm641_vm7, 0.0, %v638_v3  ;;  %v650_v35 = vsel %vm641_vm7, 0.0, %v637_v2 }
  0xbf   :  { %v1633_v25 = vadd.f32 %v651_v42, %v589_v50  ;;  %v1635_v34 = vadd.f32 %v650_v35, %v588_v56  ;;  %v1717_v42 = vmul.f32 %v1621_v1, %v1621_v1 }
  0xc0   :  { %v615_v52 = vpop.permute.xlu1 %614  ;;  %v613_v15 = vpop.permute.xlu0 %612 }
  0xc1   :  { %v640_v61 = vsel %vm628_vm6, %v615_v52, 0.0  ;;  %v639_v40 = vsel %vm628_vm6, %v613_v15, 0.0  ;;  %v1721_v35 = vmul.f32 %v1633_v25, %v1633_v25  ;;  %v1737_v41 = vmul.f32 %v1635_v34, %v1635_v34 }
  0xc2   :  { %v653_v5 = vsel %vm641_vm7, 0.0, %v640_v61  ;;  %v652_v4 = vsel %vm641_vm7, 0.0, %v639_v40 }
  0xc3   :  { %v1645_v7 = vadd.f32 %v653_v5, %v591_v37  ;;  %v1647_v21 = vadd.f32 %v652_v4, %v590_v38 }
  0xc4   :  { %v681_v30 = vpop.permute.xlu1 %680  ;;  %v679_v31 = vpop.permute.xlu0 %678 }
  0xc5   :  { %v715_v45 = vsel %vm628_vm6, %v681_v30, 0.0  ;;  %v714_v16 = vsel %vm628_vm6, %v679_v31, 0.0  ;;  %v1741_v9 = vmul.f32 %v1645_v7, %v1645_v7 }
  0xc6   :  { %v727_v11 = vsel %vm641_vm7, 0.0, %v715_v45  ;;  %v726_v27 = vsel %vm641_vm7, 0.0, %v714_v16 }
  0xc8   :  { %v685_v49 = vpop.permute.xlu1 %684  ;;  %v683_v19 = vpop.permute.xlu0 %682 }
  0xc9   :  { %v717_v50 = vsel %vm628_vm6, %v685_v49, 0.0  ;;  %v716_v54 = vsel %vm628_vm6, %v683_v19, 0.0 }
  0xca   :  { %v729_v52 = vsel %vm641_vm7, 0.0, %v717_v50  ;;  %v728_v36 = vsel %vm641_vm7, 0.0, %v716_v54 }
  0xcc   :  { %v689_v23 = vpop.permute.xlu1 %688  ;;  %v687_v46 = vpop.permute.xlu0 %686 }
  0xcd   :  { %v719_v1 = vsel %vm628_vm6, %v689_v23, 0.0  ;;  %v718_v5 = vsel %vm628_vm6, %v687_v46, 0.0 }
  0xce   :  { %v731_v34 = vsel %vm641_vm7, 0.0, %v719_v1  ;;  %v730_v7 = vsel %vm641_vm7, 0.0, %v718_v5 }
  0xd0   :  { %v1653_v60 = vpop.permute.xlu1 %692  ;;  %v1655_v17 = vpop.permute.xlu0 %690 }
  0xd1   :  { %v721_v23 = vsel %vm628_vm6, %v1653_v60, 0.0  ;;  %v720_v46 = vsel %vm628_vm6, %v1655_v17, 0.0 }
  0xd2   :  { %v733_v17 = vsel %vm641_vm7, 0.0, %v721_v23  ;;  %v732_v16 = vsel %vm641_vm7, 0.0, %v720_v46 }
  0xd4   :  { %v1662_v48 = vpop.permute.xlu1 %696  ;;  %v1664_v12 = vpop.permute.xlu0 %694 }
  0xd8   :  { %v1667_v53 = vpop.permute.xlu1 %700  ;;  %v1669_v26 = vpop.permute.xlu0 %698 }
  0xd9   :  { %v724_v50 = vsel %vm628_vm6, %v1669_v26, 0.0 }
  0xdc   :  { %v741_v62 = vpop.permute.xlu1 %740  ;;  %v739_v33 = vpop.permute.xlu0 %738 }
  0xdd   :  { %v775_v56 = vsel %vm540_vm4, 0.0, %v741_v62  ;;  %v774_v6 = vsel %vm540_vm4, 0.0, %v739_v33  ;;  %v722_v62 = vsel %vm628_vm6, %v1664_v12, 0.0  ;;  %v725_v33 = vsel %vm628_vm6, %v1667_v53, 0.0 }
  0xde   :  { %v787_v63 = vsel %vm555_vm5, 0.0, %v775_v56  ;;  %v786_v0 = vsel %vm555_vm5, 0.0, %v774_v6 }
  0xdf   :  { %v799_v3 = vsub.f32 %v727_v11, %v787_v63  ;;  %v798_v2 = vsub.f32 %v726_v27, %v786_v0 }
  0xe0   :  { %v745_v15 = vpop.permute.xlu1 %744  ;;  %v743_v37 = vpop.permute.xlu0 %742 }
  0xe1   :  { %v823_v55 = vmul.f32 %v799_v3, %v799_v3  ;;  %v822_v61 = vmul.f32 %v798_v2, %v798_v2  ;;  %v777_v38 = vsel %vm540_vm4, 0.0, %v745_v15  ;;  %v776_v40 = vsel %vm540_vm4, 0.0, %v743_v37 }
  0xe2   :  { %v789_v25 = vsel %vm555_vm5, 0.0, %v777_v38  ;;  %v788_v4 = vsel %vm555_vm5, 0.0, %v776_v40  ;;  %v1791_v38 = vsel %vm641_vm7, 0.0, %v725_v33  ;;  %v1796_v40 = vsel %vm641_vm7, 0.0, %v724_v50 }
  0xe3   :  { %v835_v30 = vadd.f32 %v823_v55, %v811_v22  ;;  %v834_v31 = vadd.f32 %v822_v61, %v810_v39  ;;  %v801_v49 = vsub.f32 %v729_v52, %v789_v25  ;;  %v800_v19 = vsub.f32 %v728_v36, %v788_v4 }
  0xe4   :  { %v749_v10 = vpop.permute.xlu1 %748  ;;  %v747_v47 = vpop.permute.xlu0 %746  ;;  %v723_v39 = vsel %vm628_vm6, %v1662_v48, 0.0  ;;  %v734_v61 = vsel %vm641_vm7, 0.0, %v722_v62 }
  0xe5   :  { %v1747_v57 = vadd.f32 1e-06, %v835_v30  ;;  %v1749_v51 = vadd.f32 1e-06, %v834_v31  ;;  %v825_v59 = vmul.f32 %v801_v49, %v801_v49  ;;  %v824_v22 = vmul.f32 %v800_v19, %v800_v19 }
  0xe6   :  { %v779_v45 = vsel %vm540_vm4, 0.0, %v749_v10  ;;  %v778_v60 = vsel %vm540_vm4, 0.0, %v747_v47  ;;  %v735_v55 = vsel %vm641_vm7, 0.0, %v723_v39 }
  0xe7   :  { %1043 = vrsqrt.f32 %v1747_v57  ;;  %v837_v6 = vadd.f32 %v825_v59, %v813_v24  ;;  %v836_v11 = vadd.f32 %v824_v22, %v812_v28  ;;  %v791_v48 = vsel %vm555_vm5, 0.0, %v779_v45 }
  0xe8   :  { %1045 = vrsqrt.f32 %v1749_v51  ;;  %v753_v54 = vpop.permute.xlu1 %752  ;;  %v751_v56 = vpop.permute.xlu0 %750  ;;  %v790_v27 = vsel %vm555_vm5, 0.0, %v778_v60  ;;  %v803_v63 = vsub.f32 %v731_v34, %v791_v48  ;;  %vm867_vm8 = vcmp.eq.f32.partialorder %v1747_v57, inf }
  0xe9   :  { %v802_v12 = vsub.f32 %v730_v7, %v790_v27  ;;  %v781_v0 = vsel %vm540_vm4, 0.0, %v753_v54  ;;  %v780_v53 = vsel %vm540_vm4, 0.0, %v751_v56  ;;  %v1777_v3 = vadd.f32 1e-06, %v837_v6 }
  0xea   :  { %v1779_v26 = vadd.f32 1e-06, %v836_v11  ;;  %v793_v24 = vsel %vm555_vm5, 0.0, %v781_v0  ;;  %v792_v28 = vsel %vm555_vm5, 0.0, %v780_v53  ;;  %v827_v2 = vmul.f32 %v803_v63, %v803_v63 }
  0xeb   :  { %v826_v52 = vmul.f32 %v802_v12, %v802_v12  ;;  %v805_v36 = vsub.f32 %v733_v17, %v793_v24  ;;  %v804_v15 = vsub.f32 %v732_v16, %v792_v28  ;;  %1047 = vrsqrt.f32 %v1777_v3 }
  0xec   :  { %v757_v37 = vpop.permute.xlu1 %756  ;;  %vm869_vm9 = vcmp.eq.f32.partialorder %v1747_v57, 0.0  ;;  %1049 = vrsqrt.f32 %v1779_v26  ;;  %v839_v1 = vadd.f32 %v827_v2, %v1693_v29  ;;  %v755_v30 = vpop.permute.xlu0 %754  ;;  %v870_v31 = vand.u32 2147483648, %v1747_v57 }
  0xed   :  { %v838_v5 = vadd.f32 %v826_v52, %v1709_v20  ;;  %v829_v25 = vmul.f32 %v805_v36, %v805_v36  ;;  %v828_v4 = vmul.f32 %v804_v15, %v804_v15  ;;  %vm860_vm11 = vcmp.eq.f32.partialorder %v1749_v51, inf }
  0xee   :  { %vm862_vm12 = vcmp.eq.f32.partialorder %v1749_v51, 0.0  ;;  %v783_v49 = vsel %vm540_vm4, 0.0, %v757_v37  ;;  %v1807_v23 = vadd.f32 1e-06, %v839_v1  ;;  %v863_v59 = vand.u32 2147483648, %v1749_v51 }
  0xef   :  { %v1809_v46 = vadd.f32 1e-06, %v838_v5  ;;  %v841_v29 = vadd.f32 %v829_v25, %v1713_v13  ;;  %v840_v20 = vadd.f32 %v828_v4, %v1717_v42  ;;  %vm881_vm13 = vcmp.eq.f32.partialorder %v1777_v3, inf }
  0xf0   :  { %v782_v22 = vsel %vm540_vm4, 0.0, %v755_v30  ;;  %v761_v34 = vpop.permute.xlu1 %760  ;;  %vm883_vm14 = vcmp.eq.f32.partialorder %v1777_v3, 0.0  ;;  %v884_v45 = vand.u32 2147483648, %v1777_v3  ;;  %1051 = vrsqrt.f32 %v1807_v23  ;;  %v759_v2 = vpop.permute.xlu0 %758 }
  0xf1   :  { %v1044_v19 = vpop.eup %1043  ;;  %vm874_vm15 = vcmp.eq.f32.partialorder %v1779_v26, inf  ;;  %1053 = vrsqrt.f32 %v1809_v46  ;;  %v795_v42 = vsel %vm555_vm5, 0.0, %v783_v49  ;;  %v794_v16 = vsel %vm555_vm5, 0.0, %v782_v22 }
  0xf2   :  { %v1046_v10 = vpop.eup %1045  ;;  %v866_v47 = vmul.f32 %v1044_v19, %v1747_v57  ;;  %v785_v39 = vsel %vm540_vm4, 0.0, %v761_v34  ;;  %v1839_v50 = vadd.f32 1e-06, %v841_v29  ;;  %v1841_v54 = vadd.f32 1e-06, %v840_v20 }
  0xf3   :  { %v859_v7 = vmul.f32 %v1046_v10, %v1749_v51  ;;  %vm876_vm0 = vcmp.eq.f32.partialorder %v1779_v26, 0.0  ;;  %v877_v6 = vand.u32 2147483648, %v1779_v26  ;;  %v807_v11 = vsub.f32 %v735_v55, %v795_v42 }
  0xf4   :  { %v868_v13 = vsel %vm867_vm8, %v1747_v57, %v866_v47  ;;  %1055 = vrsqrt.f32 %v1839_v50  ;;  %vm895_vm1 = vcmp.eq.f32.partialorder %v1807_v23, inf  ;;  %v797_v53 = vsel %vm555_vm5, 0.0, %v785_v39 }
  0xf5   :  { %v871_v60 = vsel %vm869_vm9, %v870_v31, %v868_v13  ;;  %v861_v17 = vsel %vm860_vm11, %v1749_v51, %v859_v7  ;;  %v1048_v57 = vpop.eup %1047  ;;  %v806_v51 = vsub.f32 %v734_v61, %v794_v16  ;;  %vm897_vm2 = vcmp.eq.f32.partialorder %v1807_v23, 0.0 }
  0xf6   :  { %v945_v62 = vsub.f32 %v871_v60, %v1671_v44  ;;  %v864_v33 = vsel %vm862_vm12, %v863_v59, %v861_v17  ;;  %v1050_v48 = vpop.eup %1049  ;;  %v880_v63 = vmul.f32 %v1048_v57, %v1777_v3  ;;  %v898_v28 = vand.u32 2147483648, %v1807_v23 }
  0xf7   :  { %v944_v56 = vsub.f32 %v864_v33, %v1671_v44  ;;  %v873_v0 = vmul.f32 %v1050_v48, %v1779_v26  ;;  %1057 = vrsqrt.f32 %v1841_v54  ;;  %vm888_vm3 = vcmp.eq.f32.partialorder %v1809_v46, inf }
  0xf8   :  { %v951_v27 = vmul.f32 %v1673_v58, %v945_v62  ;;  %v882_v24 = vsel %vm881_vm13, %v1777_v3, %v880_v63  ;;  %v831_v15 = vmul.f32 %v807_v11, %v807_v11  ;;  %v830_v61 = vmul.f32 %v806_v51, %v806_v51 }
  0xf9   :  { %v950_v12 = vmul.f32 %v1673_v58, %v944_v56  ;;  %v885_v52 = vsel %vm883_vm14, %v884_v45, %v882_v24  ;;  %v875_v36 = vsel %vm874_vm15, %v1779_v26, %v873_v0  ;;  %v809_v1 = vsub.f32 %v1791_v38, %v797_v53 }
  0xfa   :  { %956 = vst.msk [vmem:[#allocation8 + $0x8] sm:$0xff] %vm954_vm10, %v951_v27  ;;  %v962_v37 = vsub.f32 %v885_v52, %v1675_v14  ;;  %v878_v55 = vsel %vm876_vm0, %v877_v6, %v875_v36  ;;  %v1052_v5 = vpop.eup %1051  ;;  %vm890_vm6 = vcmp.eq.f32.partialorder %v1809_v46, 0.0  ;;  %v843_v3 = vadd.f32 %v831_v15, %v1721_v35 }
  0xfb   :  { %955 = vst.msk [vmem:[#allocation8] sm:$0xff] %vm954_vm10, %v950_v12  ;;  %v961_v25 = vsub.f32 %v878_v55, %v1675_v14  ;;  %v784_v4 = vsel %vm540_vm4, 0.0, %v759_v2  ;;  %v1054_v30 = vpop.eup %1053  ;;  %v894_v49 = vmul.f32 %v1052_v5, %v1807_v23  ;;  %v842_v26 = vadd.f32 %v830_v61, %v1737_v41 }
  0xfc   :  { %v968_v31 = vmul.f32 %v1677_v18, %v962_v37  ;;  %v833_v19 = vmul.f32 %v809_v1, %v809_v1  ;;  %v887_v38 = vmul.f32 %v1054_v30, %v1809_v46  ;;  %v855_v20 = vadd.f32 1e-06, %v843_v3 }
  0xfd   :  { %v967_v29 = vmul.f32 %v1677_v18, %v961_v25  ;;  %v796_v10 = vsel %vm555_vm5, 0.0, %v784_v4  ;;  %v896_v35 = vsel %vm895_vm1, %v1807_v23, %v894_v49  ;;  %v891_v47 = vand.u32 2147483648, %v1809_v46 }
  0xfe   :  { %973 = vst.msk [vmem:[#allocation8 + $0x18] sm:$0xff] %vm954_vm10, %v968_v31  ;;  %v854_v59 = vadd.f32 1e-06, %v842_v26  ;;  %v845_v41 = vadd.f32 %v833_v19, %v1741_v9  ;;  %v899_v22 = vsel %vm897_vm2, %v898_v28, %v896_v35  ;;  %v889_v8 = vsel %vm888_vm3, %v1809_v46, %v887_v38  ;;  %v1056_v7 = vpop.eup %1055 }
  0xff   :  { %972 = vst.msk [vmem:[#allocation8 + $0x10] sm:$0xff] %vm954_vm10, %v967_v29  ;;  %1059 = vrsqrt.f32 %v855_v20  ;;  %v808_v34 = vsub.f32 %v1796_v40, %v796_v10  ;;  %v820_v45 = vmul.f32 %v1647_v21, %v1647_v21  ;;  %v979_v13 = vsub.f32 %v899_v22, %v1679_v43 }
 0x100   :  { %v892_v9 = vsel %vm890_vm6, %v891_v47, %v889_v8  ;;  %v908_v23 = vmul.f32 %v1056_v7, %v1839_v50  ;;  %vm909_vm4 = vcmp.eq.f32.partialorder %v1839_v50, inf  ;;  %1061 = vrsqrt.f32 %v854_v59 }
 0x101   :  { %v978_v42 = vsub.f32 %v892_v9, %v1679_v43  ;;  %v1058_v60 = vpop.eup %1057  ;;  %v985_v17 = vmul.f32 %v1683_v32, %v979_v13  ;;  %vm911_vm5 = vcmp.eq.f32.partialorder %v1839_v50, 0.0  ;;  %v912_v40 = vand.u32 2147483648, %v1839_v50 }
 0x102   :  { %v857_v21 = vadd.f32 1e-06, %v845_v41  ;;  %v910_v46 = vsel %vm909_vm4, %v1839_v50, %v908_v23  ;;  %v901_v39 = vmul.f32 %v1058_v60, %v1841_v54  ;;  %v832_v62 = vmul.f32 %v808_v34, %v808_v34 }
 0x103   :  { %v984_v16 = vmul.f32 %v1683_v32, %v978_v42  ;;  %990 = vst.msk [vmem:[#allocation8 + $0x28] sm:$0xff] %vm954_vm10, %v985_v17  ;;  %v913_v33 = vsel %vm911_vm5, %v912_v40, %v910_v46  ;;  %vm902_vm7 = vcmp.eq.f32.partialorder %v1841_v54, inf  ;;  %v905_v57 = vand.u32 2147483648, %v1841_v54 }
 0x104   :  { %1063 = vrsqrt.f32 %v857_v21  ;;  %v947_v56 = vsub.f32 %v913_v33, %v1671_v44  ;;  %v903_v6 = vsel %vm902_vm7, %v1841_v54, %v901_v39  ;;  %vm904_vm8 = vcmp.eq.f32.partialorder %v1841_v54, 0.0 }
 0x105   :  { %989 = vst.msk [vmem:[#allocation8 + $0x20] sm:$0xff] %vm954_vm10, %v984_v16  ;;  %v844_v50 = vadd.f32 %v832_v62, %v820_v45  ;;  %v906_v11 = vsel %vm904_vm8, %v905_v57, %v903_v6  ;;  %vm923_vm9 = vcmp.eq.f32.partialorder %v855_v20, inf  ;;  %v926_v24 = vand.u32 2147483648, %v855_v20 }
 0x106   :  { %v953_v48 = vmul.f32 %v1673_v58, %v947_v56  ;;  %v946_v27 = vsub.f32 %v906_v11, %v1671_v44  ;;  %vm925_vm11 = vcmp.eq.f32.partialorder %v855_v20, 0.0  ;;  %vm916_vm12 = vcmp.eq.f32.partialorder %v854_v59, inf }
 0x107   :  { %v856_v63 = vadd.f32 1e-06, %v844_v50  ;;  %v919_v52 = vand.u32 2147483648, %v854_v59  ;;  %vm918_vm13 = vcmp.eq.f32.partialorder %v854_v59, 0.0  ;;  %vm937_vm14 = vcmp.eq.f32.partialorder %v857_v21, inf }
 0x108   :  { %958 = vst.msk [vmem:[#allocation8 + $0x38] sm:$0xff] %vm954_vm10, %v953_v48  ;;  %v952_v12 = vmul.f32 %v1673_v58, %v946_v27  ;;  %v940_v1 = vand.u32 2147483648, %v857_v21  ;;  %vm939_vm15 = vcmp.eq.f32.partialorder %v857_v21, 0.0 }
 0x109   :  { %v1060_v51 = vpop.eup %1059  ;;  %1065 = vrsqrt.f32 %v856_v63  ;;  %vm930_vm0 = vcmp.eq.f32.partialorder %v856_v63, inf  ;;  %v933_v26 = vand.u32 2147483648, %v856_v63  ;;  %vm932_vm1 = vcmp.eq.f32.partialorder %v856_v63, 0.0 }
 0x10a   :  { %v922_v0 = vmul.f32 %v1060_v51, %v855_v20  ;;  %v1062_v53 = vpop.eup %1061  ;;  %957 = vst.msk [vmem:[#allocation8 + $0x30] sm:$0xff] %vm954_vm10, %v952_v12 }
 0x10b   :  { %v915_v28 = vmul.f32 %v1062_v53, %v854_v59 }
 0x10c   :  { %v924_v54 = vsel %vm923_vm9, %v855_v20, %v922_v0 }
 0x10d   :  { %v927_v2 = vsel %vm925_vm11, %v926_v24, %v924_v54  ;;  %v917_v15 = vsel %vm916_vm12, %v854_v59, %v915_v28 }
 0x10e   :  { %v1064_v44 = vpop.eup %1063  ;;  %v964_v36 = vsub.f32 %v927_v2, %v1675_v14  ;;  %v920_v37 = vsel %vm918_vm13, %v919_v52, %v917_v15 }
 0x10f   :  { %v936_v58 = vmul.f32 %v1064_v44, %v857_v21  ;;  %v963_v61 = vsub.f32 %v920_v37, %v1675_v14 }
 0x110   :  { %v970_v55 = vmul.f32 %v1677_v18, %v964_v36 }
 0x111   :  { %v938_v5 = vsel %vm937_vm14, %v857_v21, %v936_v58  ;;  %v969_v25 = vmul.f32 %v1677_v18, %v963_v61 }
 0x112   :  { %975 = vst.msk [vmem:[#allocation8 + $0x48] sm:$0xff] %vm954_vm10, %v970_v55  ;;  %v941_v3 = vsel %vm939_vm15, %v940_v1, %v938_v5 }
 0x113   :  { %v1066_v4 = vpop.eup %1065  ;;  %v981_v30 = vsub.f32 %v941_v3, %v1679_v43  ;;  %974 = vst.msk [vmem:[#allocation8 + $0x40] sm:$0xff] %vm954_vm10, %v969_v25 }
 0x114   :  { %v929_v31 = vmul.f32 %v1066_v4, %v856_v63 }
 0x115   :  { %v987_v49 = vmul.f32 %v1683_v32, %v981_v30 }
 0x116   :  { %v931_v14 = vsel %vm930_vm0, %v856_v63, %v929_v31 }
 0x117   :  { %992 = vst.msk [vmem:[#allocation8 + $0x58] sm:$0xff] %vm954_vm10, %v987_v49  ;;  %v934_v19 = vsel %vm932_vm1, %v933_v26, %v931_v14 }
 0x118   :  { %v980_v18 = vsub.f32 %v934_v19, %v1679_v43 }
 0x11a   :  { %v986_v29 = vmul.f32 %v1683_v32, %v980_v18 }
 0x11c   :  { %991 = vst.msk [vmem:[#allocation8 + $0x50] sm:$0xff] %vm954_vm10, %v986_v29 }
 0x11d   :  { %1090 = shalt.err (!%p1087_p9)
}
 0x11e   :  { %s1091_s24 = scalar_lea.hbm %s1950_s4, 1536 }
 0x11f   :  { %p1092_p10 = scmp.ne.s32.totalorder %s1950_s4, %s1091_s24  ;;  %p1095_p11 = scmp.lt.u32.totalorder %s1091_s24, %s1950_s4 }
 0x121   :  { %p1097_p12 = pnand %p1095_p11, %p1092_p10 }
 0x123   :  { %1100 = shalt.err (!%p1097_p12)
}
 0x124   :  { %s1109_s27 = smov 128   ;;  %s1110_s28 = smov 8  }
 0x125   :  { %1004 = dma.vmem_to_hbm [thread:$0]  %s999_s20, 1536, %s1950_s4, [#allocation3], %s1109_s27, %s1109_s27, %s1110_s28  }
 0x126   :  { %1103 = dma.done.wait [#allocation3], 1536  }
 0x127   :  { %1104 = vsyncadd [#allocation3], 4294965760 }
 0x128   :  { %1008 = vsyncpa [#allocation3], 1 }
 0x129   :  { %1009 = vsyncpa [#allocation4], 1 }

</bundles_post_ra>
